<compile_context>
chip_gen: v7x
topology: tpu7x:2x2x1
jax: 0.10.0
libtpu: 0.0.40
codegen_flags: <defaults>
</compile_context>

<pallas_src>
import functools

import jax
import jax.numpy as jnp
from jax.experimental import pallas as pl
from jax.experimental.pallas import tpu as pltpu


# ---------------------------------------------------------------------------
# Kernel: main MLP over (batch, point-slab) grid, activations kept as (H, sub)
# ---------------------------------------------------------------------------
def decoder_mlp_kernel(p_ref, m_ref, bias_ref, wpp_ref,
                       w0s_ref, b0s_ref, w1s_ref, b1s_ref,
                       wout_ref, bout_ref, out_ref,
                       *, mm_dtype, sub_tile, n_sub):
    # Per-grid-step constants, hoisted out of the sub-chunk loop.
    m = m_ref[0]                 # (H, 3)  f32  per-batch folded fc_in matrix
    bias = bias_ref[0]           # (H, 1)  f32  per-batch effective fc_in bias
    wpp = wpp_ref[...]           # (H, 1)  f32
    wout = wout_ref[...]         # (1, H)  mm_dtype
    bout = bout_ref[...]         # (1, 1)  f32

    def chunk(j):
        start = j * sub_tile
        if not isinstance(start, int):
            start = pl.multiple_of(start, sub_tile)

        pt = p_ref[0, :, pl.ds(start, sub_tile)]              # (3, sub) f32
        pp = jnp.sum(pt * pt, axis=0, keepdims=True)           # (1, sub)

        # fc_in (folded): (H,3)@(3,sub) + rank-1 pp term + per-batch bias.
        # K=3 -> negligible MXU work; kept in f32 even on the bf16 path so raw
        # point coordinates are never quantized.
        h = (jnp.dot(m, pt, preferred_element_type=jnp.float32)
             + wpp * pp + bias)                                 # (H, sub) f32

        # 5 x ResnetBlockFC (identity shortcut: size_in == size_out).
        for i in range(5):
            a0 = jnp.maximum(h, 0.0).astype(mm_dtype)
            n0 = jnp.dot(w0s_ref[i], a0,
                         preferred_element_type=jnp.float32) + b0s_ref[i]
            a1 = jnp.maximum(n0, 0.0).astype(mm_dtype)
            h = h + jnp.dot(w1s_ref[i], a1,
                            preferred_element_type=jnp.float32) + b1s_ref[i]

        # fc_out on the MXU (o_dim == 1): (1,H)@(H,sub) -> lane-dense (1,sub).
        a_out = jnp.maximum(h, 0.0).astype(mm_dtype)
        o = jnp.dot(wout, a_out, preferred_element_type=jnp.float32) + bout

        # sigmoid: exp on the EUP + reciprocal (no VPU divide).
        sig = pl.reciprocal(1.0 + jnp.exp(-o), approx=False)
        out_ref[0, :, pl.ds(start, sub_tile)] = sig.astype(out_ref.dtype)

    if n_sub == 1:
        chunk(0)
    else:
        def body(j, carry):
            chunk(j)
            return carry
        jax.lax.fori_loop(0, n_sub, body, None, unroll=True)


# ---------------------------------------------------------------------------
# Wrapper
# ---------------------------------------------------------------------------
def _round_down_128(x):
    return max(128, (x // 128) * 128)


def decoder_inner_forward(p, z, c, params, *, t_tile=512, sub_tile=256,
                          compute_dtype=jnp.bfloat16, min_parallel_steps=4):
    """DecoderInner forward pass. Returns sigmoid(fc_out(...)) of shape (B, T)."""
    B, T, D = p.shape
    assert D == 3
    Zd = z.shape[1]
    Cd = c.shape[1]
    H, F_in = params["w_in"].shape
    assert F_in == 2 * Zd + 2 * Cd + 1

    # ---- fold VN-invariant features into fc_in (plain XLA; trivial work) -----
    w_in = params["w_in"]
    w_pp = w_in[:, 0:1]                                  # (H, 1)   * |p|^2
    w_nz = w_in[:, 1:1 + Zd]                             # (H, Zd)  * (p @ z^T)
    w_zi = w_in[:, 1 + Zd:1 + 2 * Zd]                    # (H, Zd)  * z_inv
    w_nc = w_in[:, 1 + 2 * Zd:1 + 2 * Zd + Cd]           # (H, Cd)  * (p @ c^T)
    w_ci = w_in[:, 1 + 2 * Zd + Cd:]                     # (H, Cd)  * c_inv

    z_dir = jnp.einsum("mn,bnd->bmd", params["wz"], z)   # VNLinear(z)
    c_dir = jnp.einsum("mn,bnd->bmd", params["wc"], c)   # VNLinear(c)
    z_inv = jnp.sum(z * z_dir, axis=-1)                  # (B, Zd)
    c_inv = jnp.sum(c * c_dir, axis=-1)                  # (B, Cd)

    m_b = (jnp.einsum("hn,bnd->bhd", w_nz, z)
           + jnp.einsum("hn,bnd->bhd", w_nc, c)).astype(jnp.float32)   # (B, H, 3)
    bias_b = (params["b_in"][None, :, 0]
              + jnp.einsum("hn,bn->bh", w_zi, z_inv)
              + jnp.einsum("hn,bn->bh", w_ci, c_inv))[..., None]       # (B, H, 1)
    bias_b = bias_b.astype(jnp.float32)

    # ---- tiling ---------------------------------------------------------------
    # t_tile / sub_tile are multiples of 128 (lane width); t_tile is a multiple of
    # sub_tile; never pad far past T; keep >= min_parallel_steps parallel grid
    # steps when T allows it so both v7x TensorCores stay fed.
    t_tile = _round_down_128(min(t_tile, pl.cdiv(T, 128) * 128))
    while B * pl.cdiv(T, t_tile) < min_parallel_steps and t_tile > 128:
        t_tile = _round_down_128(t_tile // 2)
    sub_tile = _round_down_128(min(sub_tile, t_tile))
    if t_tile % sub_tile != 0:
        sub_tile = 128
    n_sub = t_tile // sub_tile
    n_t = pl.cdiv(T, t_tile)
    T_pad = n_t * t_tile

    # Points in (B, 3, T) layout so points sit on lanes in the kernel.  The
    # transpose + pad is a single fused HBM copy under XLA; producing p in
    # (B, 3, T) layout upstream would remove it entirely.
    p_t = jnp.transpose(p, (0, 2, 1)).astype(jnp.float32)
    if T_pad != T:
        p_t = jnp.pad(p_t, ((0, 0), (0, 0), (0, T_pad - T)))

    # MXU-operand dtype.  bf16 is safe and free on v5e/v6e/v7x: accumulation, the
    # K=3 fc_in matmul, biases and the epilogue all stay f32.
    mm = compute_dtype
    w0s = params["w0"].astype(mm)                        # (5, H, H)
    w1s = params["w1"].astype(mm)                        # (5, H, H)
    w_out_row = params["w_out"].astype(mm)               # (1, H)

    # Grid-constant inputs: constant index_map + single VMEM buffer (no re-DMA
    # occurs anyway; avoids wasting a second buffer on v7x's 64 MiB VMEM at
    # production H).  Falls back to default double buffering on older jax.
    def const_spec(shape):
        nd = len(shape)
        idx = lambda b, t: (0,) * nd
        try:
            return pl.BlockSpec(shape, idx,
                                pipeline_mode=pl.Buffered(buffer_count=1))
        except (TypeError, AttributeError):
            return pl.BlockSpec(shape, idx)

    kernel = functools.partial(decoder_mlp_kernel, mm_dtype=mm,
                               sub_tile=sub_tile, n_sub=n_sub)

    out = pl.pallas_call(
        kernel,
        out_shape=jax.ShapeDtypeStruct((B, 1, T_pad), jnp.float32),
        grid_spec=pltpu.PrefetchScalarGridSpec(
            num_scalar_prefetch=0,
            grid=(B, n_t),
            in_specs=[
                pl.BlockSpec((1, 3, t_tile), lambda b, t: (b, 0, t)),   # p^T slab
                pl.BlockSpec((1, H, 3), lambda b, t: (b, 0, 0)),        # m_b
                pl.BlockSpec((1, H, 1), lambda b, t: (b, 0, 0)),        # bias_b
                const_spec((H, 1)),                                     # w_pp
                const_spec((5, H, H)),                                  # w0 stack
                const_spec((5, H, 1)),                                  # b0 stack
                const_spec((5, H, H)),                                  # w1 stack
                const_spec((5, H, 1)),                                  # b1 stack
                const_spec((1, H)),                                     # w_out row
                const_spec((1, 1)),                                     # b_out
            ],
            out_specs=pl.BlockSpec((1, 1, t_tile), lambda b, t: (b, 0, t)),
        ),
        compiler_params=pltpu.CompilerParams(
            dimension_semantics=("parallel", "parallel"),
            vmem_limit_bytes=32 * 1024 * 1024),
    )(p_t, m_b, bias_b, w_pp, w0s, params["b0"], w1s, params["b1"],
      w_out_row, params["b_out"])

    return out[:, 0, :T]                                 # (B, T), like squeeze(-1)


# ---------------------------------------------------------------------------
# Pure-JAX reference (mirrors the PyTorch forward, PyTorch (out, in) weights)
# ---------------------------------------------------------------------------
def decoder_inner_reference(p, z, c, params):
    B, T, D = p.shape
    net = jnp.sum(p * p, axis=2, keepdims=True)                       # (B, T, 1)
    net_z = jnp.einsum("bmi,bni->bmn", p, z)
    z_dir = jnp.einsum("mn,bnd->bmd", params["wz"], z)
    z_inv = jnp.repeat(jnp.sum(z * z_dir, axis=-1)[:, None, :], T, axis=1)
    net_c = jnp.einsum("bmi,bni->bmn", p, c)
    c_dir = jnp.einsum("mn,bnd->bmd", params["wc"], c)
    c_inv = jnp.repeat(jnp.sum(c * c_dir, axis=-1)[:, None, :], T, axis=1)
    net = jnp.concatenate([net, net_z, z_inv, net_c, c_inv], axis=2)  # (B, T, F_in)

    h = jnp.einsum("btf,hf->bth", net, params["w_in"]) + params["b_in"][:, 0]
    for i in range(5):
        a0 = jax.nn.relu(h)
        n0 = jnp.einsum("bth,oh->bto", a0, params["w0"][i]) + params["b0"][i][:, 0]
        dx = (jnp.einsum("bth,oh->bto", jax.nn.relu(n0), params["w1"][i])
              + params["b1"][i][:, 0])
        h = h + dx
    o = (jnp.einsum("bth,oh->bto", jax.nn.relu(h), params["w_out"])
         + params["b_out"][:, 0])
    return jax.nn.sigmoid(o[..., 0])


# ---------------------------------------------------------------------------
# Main
# ---------------------------------------------------------------------------
if __name__ == "__main__":
    B, T, D = 2, 200, 3                 # T deliberately not a multiple of the tile
    Z_DIM, C_DIM, HIDDEN = 16, 16, 32
    F_IN = 2 * Z_DIM + 2 * C_DIM + 1

    key = jax.random.PRNGKey(0)
    keys = jax.random.split(key, 13)
    normal = jax.random.normal

    p = normal(keys[0], (B, T, D), jnp.float32)
    z = normal(keys[1], (B, Z_DIM, D), jnp.float32)
    c = normal(keys[2], (B, C_DIM, D), jnp.float32)

    s = 0.1
    params = {
        "wz": s * normal(keys[3], (Z_DIM, Z_DIM), jnp.float32),
        "wc": s * normal(keys[4], (C_DIM, C_DIM), jnp.float32),
        "w_in": s * normal(keys[5], (HIDDEN, F_IN), jnp.float32),
        "b_in": s * normal(keys[6], (HIDDEN, 1), jnp.float32),
        "w0": s * normal(keys[7], (5, HIDDEN, HIDDEN), jnp.float32),
        "b0": s * normal(keys[8], (5, HIDDEN, 1), jnp.float32),
        # NOTE: PyTorch zero-inits fc_1.weight; random here to exercise the path.
        "w1": s * normal(keys[9], (5, HIDDEN, HIDDEN), jnp.float32),
        "b1": s * normal(keys[10], (5, HIDDEN, 1), jnp.float32),
        "w_out": s * normal(keys[11], (1, HIDDEN), jnp.float32),
        "b_out": s * normal(keys[12], (1, 1), jnp.float32),
    }

    ref = jax.block_until_ready(decoder_inner_reference(p, z, c, params))

    # f32 MXU-operand path, auto tiling: t_tile shrinks to 128 to keep 4 parallel
    # grid steps -> grid (2, 2), n_sub = 1 (strict numerical check).
    out_f32 = jax.block_until_ready(
        decoder_inner_forward(p, z, c, params, compute_dtype=jnp.float32))
    assert out_f32.shape == (B, T), out_f32.shape
    assert jnp.allclose(out_f32, ref, rtol=1e-5, atol=1e-5), (
        f"f32 max abs err = {jnp.max(jnp.abs(out_f32 - ref))}")

    # Default bf16-operand path (recommended on v5e/v6e/v7x alike) with a 256-point
    # slab and an inner 2-step 128-lane sub-chunk loop: grid (2, 1), n_sub = 2.
    out_bf16 = jax.block_until_ready(
        decoder_inner_forward(p, z, c, params, t_tile=256, sub_tile=128,
                              min_parallel_steps=1))
    assert out_bf16.shape == (B, T), out_bf16.shape
    assert jnp.allclose(out_bf16, ref, rtol=2e-2, atol=2e-2), (
        f"bf16 max abs err = {jnp.max(jnp.abs(out_bf16 - ref))}")

    print("KERNEL_OK")
</pallas_src>

<mosaic_0001>
module attributes {stable_mosaic.version = 11 : i64} {
  func.func @decoder_mlp_kernel(%arg0: i32, %arg1: i32, %arg2: memref<1x3x128xf32, #tpu.memory_space<vmem>>, %arg3: memref<1x32x3xf32, #tpu.memory_space<vmem>>, %arg4: memref<1x32x1xf32, #tpu.memory_space<vmem>>, %arg5: memref<32x1xf32, #tpu.memory_space<vmem>>, %arg6: memref<5x32x32xf32, #tpu.memory_space<vmem>>, %arg7: memref<5x32x1xf32, #tpu.memory_space<vmem>>, %arg8: memref<5x32x32xf32, #tpu.memory_space<vmem>>, %arg9: memref<5x32x1xf32, #tpu.memory_space<vmem>>, %arg10: memref<1x32xf32, #tpu.memory_space<vmem>>, %arg11: memref<1x1xf32, #tpu.memory_space<vmem>>, %arg12: memref<1x1x128xf32, #tpu.memory_space<vmem>>) attributes {dimension_semantics = [#tpu.dimension_semantics<parallel>, #tpu.dimension_semantics<parallel>], iteration_bounds = array<i64: 2, 2>, scalar_prefetch = 0 : i64, scratch_operands = 0 : i64, tpu.core_type = #tpu.core_type<tc>, window_params = [{transform_indices = @transform_0, window_bounds = array<i64: 1, 3, 128>}, {transform_indices = @transform_1, window_bounds = array<i64: 1, 32, 3>}, {transform_indices = @transform_2, window_bounds = array<i64: 1, 32, 1>}, {pipeline_mode = #tpu.pipeline_mode<synchronous>, transform_indices = @transform_3, window_bounds = array<i64: 32, 1>}, {pipeline_mode = #tpu.pipeline_mode<synchronous>, transform_indices = @transform_4, window_bounds = array<i64: 5, 32, 32>}, {pipeline_mode = #tpu.pipeline_mode<synchronous>, transform_indices = @transform_5, window_bounds = array<i64: 5, 32, 1>}, {pipeline_mode = #tpu.pipeline_mode<synchronous>, transform_indices = @transform_6, window_bounds = array<i64: 5, 32, 32>}, {pipeline_mode = #tpu.pipeline_mode<synchronous>, transform_indices = @transform_7, window_bounds = array<i64: 5, 32, 1>}, {pipeline_mode = #tpu.pipeline_mode<synchronous>, transform_indices = @transform_8, window_bounds = array<i64: 1, 32>}, {pipeline_mode = #tpu.pipeline_mode<synchronous>, transform_indices = @transform_9, window_bounds = array<i64: 1, 1>}, {transform_indices = @transform_10, window_bounds = array<i64: 1, 1, 128>}]} {
    %c0 = arith.constant 0 : index
    %c0_0 = arith.constant 0 : index
    %c0_1 = arith.constant 0 : index
    %0 = vector.load %arg3[%c0, %c0_0, %c0_1] : memref<1x32x3xf32, #tpu.memory_space<vmem>>, vector<1x32x3xf32>
    %1 = vector.shape_cast %0 : vector<1x32x3xf32> to vector<32x3xf32>
    %c0_2 = arith.constant 0 : index
    %c0_3 = arith.constant 0 : index
    %c0_4 = arith.constant 0 : index
    %2 = vector.load %arg4[%c0_2, %c0_3, %c0_4] : memref<1x32x1xf32, #tpu.memory_space<vmem>>, vector<1x32x1xf32>
    %3 = vector.shape_cast %2 : vector<1x32x1xf32> to vector<32x1xf32>
    %c0_5 = arith.constant 0 : index
    %c0_6 = arith.constant 0 : index
    %4 = vector.load %arg5[%c0_5, %c0_6] : memref<32x1xf32, #tpu.memory_space<vmem>>, vector<32x1xf32>
    %c0_7 = arith.constant 0 : index
    %c0_8 = arith.constant 0 : index
    %5 = vector.load %arg10[%c0_7, %c0_8] : memref<1x32xf32, #tpu.memory_space<vmem>>, vector<1x32xf32>
    %c0_9 = arith.constant 0 : index
    %c0_10 = arith.constant 0 : index
    %6 = vector.load %arg11[%c0_9, %c0_10] : memref<1x1xf32, #tpu.memory_space<vmem>>, vector<1x1xf32>
    %c0_11 = arith.constant 0 : index
    %c0_12 = arith.constant 0 : index
    %c0_13 = arith.constant 0 : index
    %7 = vector.load %arg2[%c0_11, %c0_12, %c0_13] : memref<1x3x128xf32, #tpu.memory_space<vmem>>, vector<1x3x128xf32>
    %8 = vector.shape_cast %7 : vector<1x3x128xf32> to vector<3x128xf32>
    %9 = arith.mulf %8, %8 : vector<3x128xf32>
    %cst = arith.constant dense<0.000000e+00> : vector<128xf32>
    %10 = vector.multi_reduction <add>, %9, %cst [0] : vector<3x128xf32> to vector<128xf32>
    %11 = vector.shape_cast %10 : vector<128xf32> to vector<1x128xf32>
    %cst_14 = arith.constant dense<0.000000e+00> : vector<32x128xf32>
    %12 = tpu.matmul %1, %8, %cst_14 {dimension_numbers = #tpu.dot_dimension_numbers<[1], [0], [0], [1], [0, 0, 1, 1], [], []>} : vector<32x3xf32>, vector<3x128xf32>, vector<32x128xf32> -> vector<32x128xf32>
    %13 = vector.broadcast %4 : vector<32x1xf32> to vector<32x128xf32>
    %14 = vector.broadcast %11 : vector<1x128xf32> to vector<32x128xf32>
    %15 = arith.mulf %13, %14 : vector<32x128xf32>
    %16 = arith.addf %12, %15 : vector<32x128xf32>
    %17 = vector.broadcast %3 : vector<32x1xf32> to vector<32x128xf32>
    %18 = arith.addf %16, %17 : vector<32x128xf32>
    %cst_15 = arith.constant 0.000000e+00 : f32
    %19 = vector.broadcast %cst_15 : f32 to vector<32x128xf32>
    %20 = arith.maximumf %18, %19 : vector<32x128xf32>
    %c0_16 = arith.constant 0 : index
    %c0_17 = arith.constant 0 : index
    %c0_18 = arith.constant 0 : index
    %21 = vector.load %arg6[%c0_16, %c0_17, %c0_18] : memref<5x32x32xf32, #tpu.memory_space<vmem>>, vector<1x32x32xf32>
    %22 = vector.shape_cast %21 : vector<1x32x32xf32> to vector<32x32xf32>
    %cst_19 = arith.constant dense<0.000000e+00> : vector<32x128xf32>
    %23 = tpu.matmul %22, %20, %cst_19 {dimension_numbers = #tpu.dot_dimension_numbers<[1], [0], [0], [1], [0, 0, 1, 1], [], []>} : vector<32x32xf32>, vector<32x128xf32>, vector<32x128xf32> -> vector<32x128xf32>
    %c0_20 = arith.constant 0 : index
    %c0_21 = arith.constant 0 : index
    %c0_22 = arith.constant 0 : index
    %24 = vector.load %arg7[%c0_20, %c0_21, %c0_22] : memref<5x32x1xf32, #tpu.memory_space<vmem>>, vector<1x32x1xf32>
    %25 = vector.shape_cast %24 : vector<1x32x1xf32> to vector<32x1xf32>
    %26 = vector.broadcast %25 : vector<32x1xf32> to vector<32x128xf32>
    %27 = arith.addf %23, %26 : vector<32x128xf32>
    %cst_23 = arith.constant 0.000000e+00 : f32
    %28 = vector.broadcast %cst_23 : f32 to vector<32x128xf32>
    %29 = arith.maximumf %27, %28 : vector<32x128xf32>
    %c0_24 = arith.constant 0 : index
    %c0_25 = arith.constant 0 : index
    %c0_26 = arith.constant 0 : index
    %30 = vector.load %arg8[%c0_24, %c0_25, %c0_26] : memref<5x32x32xf32, #tpu.memory_space<vmem>>, vector<1x32x32xf32>
    %31 = vector.shape_cast %30 : vector<1x32x32xf32> to vector<32x32xf32>
    %cst_27 = arith.constant dense<0.000000e+00> : vector<32x128xf32>
    %32 = tpu.matmul %31, %29, %cst_27 {dimension_numbers = #tpu.dot_dimension_numbers<[1], [0], [0], [1], [0, 0, 1, 1], [], []>} : vector<32x32xf32>, vector<32x128xf32>, vector<32x128xf32> -> vector<32x128xf32>
    %33 = arith.addf %18, %32 : vector<32x128xf32>
    %c0_28 = arith.constant 0 : index
    %c0_29 = arith.constant 0 : index
    %c0_30 = arith.constant 0 : index
    %34 = vector.load %arg9[%c0_28, %c0_29, %c0_30] : memref<5x32x1xf32, #tpu.memory_space<vmem>>, vector<1x32x1xf32>
    %35 = vector.shape_cast %34 : vector<1x32x1xf32> to vector<32x1xf32>
    %36 = vector.broadcast %35 : vector<32x1xf32> to vector<32x128xf32>
    %37 = arith.addf %33, %36 : vector<32x128xf32>
    %cst_31 = arith.constant 0.000000e+00 : f32
    %38 = vector.broadcast %cst_31 : f32 to vector<32x128xf32>
    %39 = arith.maximumf %37, %38 : vector<32x128xf32>
    %c1 = arith.constant 1 : index
    %c0_32 = arith.constant 0 : index
    %c0_33 = arith.constant 0 : index
    %40 = vector.load %arg6[%c1, %c0_32, %c0_33] : memref<5x32x32xf32, #tpu.memory_space<vmem>>, vector<1x32x32xf32>
    %41 = vector.shape_cast %40 : vector<1x32x32xf32> to vector<32x32xf32>
    %cst_34 = arith.constant dense<0.000000e+00> : vector<32x128xf32>
    %42 = tpu.matmul %41, %39, %cst_34 {dimension_numbers = #tpu.dot_dimension_numbers<[1], [0], [0], [1], [0, 0, 1, 1], [], []>} : vector<32x32xf32>, vector<32x128xf32>, vector<32x128xf32> -> vector<32x128xf32>
    %c1_35 = arith.constant 1 : index
    %c0_36 = arith.constant 0 : index
    %c0_37 = arith.constant 0 : index
    %43 = vector.load %arg7[%c1_35, %c0_36, %c0_37] : memref<5x32x1xf32, #tpu.memory_space<vmem>>, vector<1x32x1xf32>
    %44 = vector.shape_cast %43 : vector<1x32x1xf32> to vector<32x1xf32>
    %45 = vector.broadcast %44 : vector<32x1xf32> to vector<32x128xf32>
    %46 = arith.addf %42, %45 : vector<32x128xf32>
    %cst_38 = arith.constant 0.000000e+00 : f32
    %47 = vector.broadcast %cst_38 : f32 to vector<32x128xf32>
    %48 = arith.maximumf %46, %47 : vector<32x128xf32>
    %c1_39 = arith.constant 1 : index
    %c0_40 = arith.constant 0 : index
    %c0_41 = arith.constant 0 : index
    %49 = vector.load %arg8[%c1_39, %c0_40, %c0_41] : memref<5x32x32xf32, #tpu.memory_space<vmem>>, vector<1x32x32xf32>
    %50 = vector.shape_cast %49 : vector<1x32x32xf32> to vector<32x32xf32>
    %cst_42 = arith.constant dense<0.000000e+00> : vector<32x128xf32>
    %51 = tpu.matmul %50, %48, %cst_42 {dimension_numbers = #tpu.dot_dimension_numbers<[1], [0], [0], [1], [0, 0, 1, 1], [], []>} : vector<32x32xf32>, vector<32x128xf32>, vector<32x128xf32> -> vector<32x128xf32>
    %52 = arith.addf %37, %51 : vector<32x128xf32>
    %c1_43 = arith.constant 1 : index
    %c0_44 = arith.constant 0 : index
    %c0_45 = arith.constant 0 : index
    %53 = vector.load %arg9[%c1_43, %c0_44, %c0_45] : memref<5x32x1xf32, #tpu.memory_space<vmem>>, vector<1x32x1xf32>
    %54 = vector.shape_cast %53 : vector<1x32x1xf32> to vector<32x1xf32>
    %55 = vector.broadcast %54 : vector<32x1xf32> to vector<32x128xf32>
    %56 = arith.addf %52, %55 : vector<32x128xf32>
    %cst_46 = arith.constant 0.000000e+00 : f32
    %57 = vector.broadcast %cst_46 : f32 to vector<32x128xf32>
    %58 = arith.maximumf %56, %57 : vector<32x128xf32>
    %c2 = arith.constant 2 : index
    %c0_47 = arith.constant 0 : index
    %c0_48 = arith.constant 0 : index
    %59 = vector.load %arg6[%c2, %c0_47, %c0_48] : memref<5x32x32xf32, #tpu.memory_space<vmem>>, vector<1x32x32xf32>
    %60 = vector.shape_cast %59 : vector<1x32x32xf32> to vector<32x32xf32>
    %cst_49 = arith.constant dense<0.000000e+00> : vector<32x128xf32>
    %61 = tpu.matmul %60, %58, %cst_49 {dimension_numbers = #tpu.dot_dimension_numbers<[1], [0], [0], [1], [0, 0, 1, 1], [], []>} : vector<32x32xf32>, vector<32x128xf32>, vector<32x128xf32> -> vector<32x128xf32>
    %c2_50 = arith.constant 2 : index
    %c0_51 = arith.constant 0 : index
    %c0_52 = arith.constant 0 : index
    %62 = vector.load %arg7[%c2_50, %c0_51, %c0_52] : memref<5x32x1xf32, #tpu.memory_space<vmem>>, vector<1x32x1xf32>
    %63 = vector.shape_cast %62 : vector<1x32x1xf32> to vector<32x1xf32>
    %64 = vector.broadcast %63 : vector<32x1xf32> to vector<32x128xf32>
    %65 = arith.addf %61, %64 : vector<32x128xf32>
    %cst_53 = arith.constant 0.000000e+00 : f32
    %66 = vector.broadcast %cst_53 : f32 to vector<32x128xf32>
    %67 = arith.maximumf %65, %66 : vector<32x128xf32>
    %c2_54 = arith.constant 2 : index
    %c0_55 = arith.constant 0 : index
    %c0_56 = arith.constant 0 : index
    %68 = vector.load %arg8[%c2_54, %c0_55, %c0_56] : memref<5x32x32xf32, #tpu.memory_space<vmem>>, vector<1x32x32xf32>
    %69 = vector.shape_cast %68 : vector<1x32x32xf32> to vector<32x32xf32>
    %cst_57 = arith.constant dense<0.000000e+00> : vector<32x128xf32>
    %70 = tpu.matmul %69, %67, %cst_57 {dimension_numbers = #tpu.dot_dimension_numbers<[1], [0], [0], [1], [0, 0, 1, 1], [], []>} : vector<32x32xf32>, vector<32x128xf32>, vector<32x128xf32> -> vector<32x128xf32>
    %71 = arith.addf %56, %70 : vector<32x128xf32>
    %c2_58 = arith.constant 2 : index
    %c0_59 = arith.constant 0 : index
    %c0_60 = arith.constant 0 : index
    %72 = vector.load %arg9[%c2_58, %c0_59, %c0_60] : memref<5x32x1xf32, #tpu.memory_space<vmem>>, vector<1x32x1xf32>
    %73 = vector.shape_cast %72 : vector<1x32x1xf32> to vector<32x1xf32>
    %74 = vector.broadcast %73 : vector<32x1xf32> to vector<32x128xf32>
    %75 = arith.addf %71, %74 : vector<32x128xf32>
    %cst_61 = arith.constant 0.000000e+00 : f32
    %76 = vector.broadcast %cst_61 : f32 to vector<32x128xf32>
    %77 = arith.maximumf %75, %76 : vector<32x128xf32>
    %c3 = arith.constant 3 : index
    %c0_62 = arith.constant 0 : index
    %c0_63 = arith.constant 0 : index
    %78 = vector.load %arg6[%c3, %c0_62, %c0_63] : memref<5x32x32xf32, #tpu.memory_space<vmem>>, vector<1x32x32xf32>
    %79 = vector.shape_cast %78 : vector<1x32x32xf32> to vector<32x32xf32>
    %cst_64 = arith.constant dense<0.000000e+00> : vector<32x128xf32>
    %80 = tpu.matmul %79, %77, %cst_64 {dimension_numbers = #tpu.dot_dimension_numbers<[1], [0], [0], [1], [0, 0, 1, 1], [], []>} : vector<32x32xf32>, vector<32x128xf32>, vector<32x128xf32> -> vector<32x128xf32>
    %c3_65 = arith.constant 3 : index
    %c0_66 = arith.constant 0 : index
    %c0_67 = arith.constant 0 : index
    %81 = vector.load %arg7[%c3_65, %c0_66, %c0_67] : memref<5x32x1xf32, #tpu.memory_space<vmem>>, vector<1x32x1xf32>
    %82 = vector.shape_cast %81 : vector<1x32x1xf32> to vector<32x1xf32>
    %83 = vector.broadcast %82 : vector<32x1xf32> to vector<32x128xf32>
    %84 = arith.addf %80, %83 : vector<32x128xf32>
    %cst_68 = arith.constant 0.000000e+00 : f32
    %85 = vector.broadcast %cst_68 : f32 to vector<32x128xf32>
    %86 = arith.maximumf %84, %85 : vector<32x128xf32>
    %c3_69 = arith.constant 3 : index
    %c0_70 = arith.constant 0 : index
    %c0_71 = arith.constant 0 : index
    %87 = vector.load %arg8[%c3_69, %c0_70, %c0_71] : memref<5x32x32xf32, #tpu.memory_space<vmem>>, vector<1x32x32xf32>
    %88 = vector.shape_cast %87 : vector<1x32x32xf32> to vector<32x32xf32>
    %cst_72 = arith.constant dense<0.000000e+00> : vector<32x128xf32>
    %89 = tpu.matmul %88, %86, %cst_72 {dimension_numbers = #tpu.dot_dimension_numbers<[1], [0], [0], [1], [0, 0, 1, 1], [], []>} : vector<32x32xf32>, vector<32x128xf32>, vector<32x128xf32> -> vector<32x128xf32>
    %90 = arith.addf %75, %89 : vector<32x128xf32>
    %c3_73 = arith.constant 3 : index
    %c0_74 = arith.constant 0 : index
    %c0_75 = arith.constant 0 : index
    %91 = vector.load %arg9[%c3_73, %c0_74, %c0_75] : memref<5x32x1xf32, #tpu.memory_space<vmem>>, vector<1x32x1xf32>
    %92 = vector.shape_cast %91 : vector<1x32x1xf32> to vector<32x1xf32>
    %93 = vector.broadcast %92 : vector<32x1xf32> to vector<32x128xf32>
    %94 = arith.addf %90, %93 : vector<32x128xf32>
    %cst_76 = arith.constant 0.000000e+00 : f32
    %95 = vector.broadcast %cst_76 : f32 to vector<32x128xf32>
    %96 = arith.maximumf %94, %95 : vector<32x128xf32>
    %c4 = arith.constant 4 : index
    %c0_77 = arith.constant 0 : index
    %c0_78 = arith.constant 0 : index
    %97 = vector.load %arg6[%c4, %c0_77, %c0_78] : memref<5x32x32xf32, #tpu.memory_space<vmem>>, vector<1x32x32xf32>
    %98 = vector.shape_cast %97 : vector<1x32x32xf32> to vector<32x32xf32>
    %cst_79 = arith.constant dense<0.000000e+00> : vector<32x128xf32>
    %99 = tpu.matmul %98, %96, %cst_79 {dimension_numbers = #tpu.dot_dimension_numbers<[1], [0], [0], [1], [0, 0, 1, 1], [], []>} : vector<32x32xf32>, vector<32x128xf32>, vector<32x128xf32> -> vector<32x128xf32>
    %c4_80 = arith.constant 4 : index
    %c0_81 = arith.constant 0 : index
    %c0_82 = arith.constant 0 : index
    %100 = vector.load %arg7[%c4_80, %c0_81, %c0_82] : memref<5x32x1xf32, #tpu.memory_space<vmem>>, vector<1x32x1xf32>
    %101 = vector.shape_cast %100 : vector<1x32x1xf32> to vector<32x1xf32>
    %102 = vector.broadcast %101 : vector<32x1xf32> to vector<32x128xf32>
    %103 = arith.addf %99, %102 : vector<32x128xf32>
    %cst_83 = arith.constant 0.000000e+00 : f32
    %104 = vector.broadcast %cst_83 : f32 to vector<32x128xf32>
    %105 = arith.maximumf %103, %104 : vector<32x128xf32>
    %c4_84 = arith.constant 4 : index
    %c0_85 = arith.constant 0 : index
    %c0_86 = arith.constant 0 : index
    %106 = vector.load %arg8[%c4_84, %c0_85, %c0_86] : memref<5x32x32xf32, #tpu.memory_space<vmem>>, vector<1x32x32xf32>
    %107 = vector.shape_cast %106 : vector<1x32x32xf32> to vector<32x32xf32>
    %cst_87 = arith.constant dense<0.000000e+00> : vector<32x128xf32>
    %108 = tpu.matmul %107, %105, %cst_87 {dimension_numbers = #tpu.dot_dimension_numbers<[1], [0], [0], [1], [0, 0, 1, 1], [], []>} : vector<32x32xf32>, vector<32x128xf32>, vector<32x128xf32> -> vector<32x128xf32>
    %109 = arith.addf %94, %108 : vector<32x128xf32>
    %c4_88 = arith.constant 4 : index
    %c0_89 = arith.constant 0 : index
    %c0_90 = arith.constant 0 : index
    %110 = vector.load %arg9[%c4_88, %c0_89, %c0_90] : memref<5x32x1xf32, #tpu.memory_space<vmem>>, vector<1x32x1xf32>
    %111 = vector.shape_cast %110 : vector<1x32x1xf32> to vector<32x1xf32>
    %112 = vector.broadcast %111 : vector<32x1xf32> to vector<32x128xf32>
    %113 = arith.addf %109, %112 : vector<32x128xf32>
    %cst_91 = arith.constant 0.000000e+00 : f32
    %114 = vector.broadcast %cst_91 : f32 to vector<32x128xf32>
    %115 = arith.maximumf %113, %114 : vector<32x128xf32>
    %cst_92 = arith.constant dense<0.000000e+00> : vector<1x128xf32>
    %116 = tpu.matmul %5, %115, %cst_92 {dimension_numbers = #tpu.dot_dimension_numbers<[1], [0], [0], [1], [0, 0, 1, 1], [], []>} : vector<1x32xf32>, vector<32x128xf32>, vector<1x128xf32> -> vector<1x128xf32>
    %117 = vector.broadcast %6 : vector<1x1xf32> to vector<1x128xf32>
    %118 = arith.addf %116, %117 : vector<1x128xf32>
    %cst_93 = arith.constant 0.000000e+00 : f32
    %119 = vector.broadcast %cst_93 : f32 to vector<1x128xf32>
    %120 = arith.subf %119, %118 : vector<1x128xf32>
    %121 = math.exp %120 : vector<1x128xf32>
    %cst_94 = arith.constant 1.000000e+00 : f32
    %122 = vector.broadcast %cst_94 : f32 to vector<1x128xf32>
    %123 = arith.addf %122, %121 : vector<1x128xf32>
    %124 = tpu.reciprocal %123 : vector<1x128xf32> -> vector<1x128xf32>
    %c0_95 = arith.constant 0 : index
    %c0_96 = arith.constant 0 : index
    %c0_97 = arith.constant 0 : index
    %125 = vector.load %arg12[%c0_95, %c0_96, %c0_97] : memref<1x1x128xf32, #tpu.memory_space<vmem>>, vector<1x1x128xf32>
    %126 = vector.shape_cast %125 : vector<1x1x128xf32> to vector<1x128xf32>
    %127 = vector.shape_cast %124 : vector<1x128xf32> to vector<1x1x128xf32>
    tpu.vector_store %arg12[%c0_95, %c0_96, %c0_97], %127 {strides = array<i32>} : memref<1x1x128xf32, #tpu.memory_space<vmem>>, vector<1x1x128xf32>,
    return
  }
  func.func @transform_0(%arg0: i32, %arg1: i32) -> (i32, i32, i32) {
    %c0_i32 = arith.constant 0 : i32
    %c0_i32_0 = arith.constant 0 : i32
    return %arg0, %c0_i32, %arg1 : i32, i32, i32
  }
  func.func @transform_1(%arg0: i32, %arg1: i32) -> (i32, i32, i32) {
    %c0_i32 = arith.constant 0 : i32
    %c0_i32_0 = arith.constant 0 : i32
    %c0_i32_1 = arith.constant 0 : i32
    return %arg0, %c0_i32, %c0_i32_0 : i32, i32, i32
  }
  func.func @transform_2(%arg0: i32, %arg1: i32) -> (i32, i32, i32) {
    %c0_i32 = arith.constant 0 : i32
    %c0_i32_0 = arith.constant 0 : i32
    %c0_i32_1 = arith.constant 0 : i32
    return %arg0, %c0_i32, %c0_i32_0 : i32, i32, i32
  }
  func.func @transform_3(%arg0: i32, %arg1: i32) -> (i32, i32) {
    %c0_i32 = arith.constant 0 : i32
    %c0_i32_0 = arith.constant 0 : i32
    %c0_i32_1 = arith.constant 0 : i32
    return %c0_i32, %c0_i32_0 : i32, i32
  }
  func.func @transform_4(%arg0: i32, %arg1: i32) -> (i32, i32, i32) {
    %c0_i32 = arith.constant 0 : i32
    %c0_i32_0 = arith.constant 0 : i32
    %c0_i32_1 = arith.constant 0 : i32
    %c0_i32_2 = arith.constant 0 : i32
    return %c0_i32, %c0_i32_0, %c0_i32_1 : i32, i32, i32
  }
  func.func @transform_5(%arg0: i32, %arg1: i32) -> (i32, i32, i32) {
    %c0_i32 = arith.constant 0 : i32
    %c0_i32_0 = arith.constant 0 : i32
    %c0_i32_1 = arith.constant 0 : i32
    %c0_i32_2 = arith.constant 0 : i32
    return %c0_i32, %c0_i32_0, %c0_i32_1 : i32, i32, i32
  }
  func.func @transform_6(%arg0: i32, %arg1: i32) -> (i32, i32, i32) {
    %c0_i32 = arith.constant 0 : i32
    %c0_i32_0 = arith.constant 0 : i32
    %c0_i32_1 = arith.constant 0 : i32
    %c0_i32_2 = arith.constant 0 : i32
    return %c0_i32, %c0_i32_0, %c0_i32_1 : i32, i32, i32
  }
  func.func @transform_7(%arg0: i32, %arg1: i32) -> (i32, i32, i32) {
    %c0_i32 = arith.constant 0 : i32
    %c0_i32_0 = arith.constant 0 : i32
    %c0_i32_1 = arith.constant 0 : i32
    %c0_i32_2 = arith.constant 0 : i32
    return %c0_i32, %c0_i32_0, %c0_i32_1 : i32, i32, i32
  }
  func.func @transform_8(%arg0: i32, %arg1: i32) -> (i32, i32) {
    %c0_i32 = arith.constant 0 : i32
    %c0_i32_0 = arith.constant 0 : i32
    %c0_i32_1 = arith.constant 0 : i32
    return %c0_i32, %c0_i32_0 : i32, i32
  }
  func.func @transform_9(%arg0: i32, %arg1: i32) -> (i32, i32) {
    %c0_i32 = arith.constant 0 : i32
    %c0_i32_0 = arith.constant 0 : i32
    %c0_i32_1 = arith.constant 0 : i32
    return %c0_i32, %c0_i32_0 : i32, i32
  }
  func.func @transform_10(%arg0: i32, %arg1: i32) -> (i32, i32, i32) {
    %c0_i32 = arith.constant 0 : i32
    %c0_i32_0 = arith.constant 0 : i32
    return %arg0, %c0_i32, %arg1 : i32, i32, i32
  }
}

</mosaic_0001>

<bundles_post_ra>
// kernel: tpu_custom_call.1
= control target key start
LH: loop header
LB: loop body
LE: loop exit
PB: predicated region body
PF: predicated region fallthrough
CT: control target
= control target key end

     0   :  { %s3310_s0 = inlined_call_operand.vmem [shape: f32[2,3,256], index: 0, kind: input, shape index: {}]   ;;  %s3311_s1 = inlined_call_operand.vmem [shape: f32[2,32,3], index: 1, kind: input, shape index: {}]   ;;  %s3312_s2 = inlined_call_operand.vmem [shape: f32[2,32,1], index: 2, kind: input, shape index: {}]   ;;  %s3313_s3 = inlined_call_operand.vmem [shape: f32[32,1], index: 3, kind: input, shape index: {}]   ;;  %s3314_s4 = inlined_call_operand.vmem [shape: f32[5,32,32], index: 4, kind: input, shape index: {}]   ;;  %s3315_s5 = inlined_call_operand.vmem [shape: f32[5,32,1], index: 5, kind: input, shape index: {}]   ;;  %s3316_s6 = inlined_call_operand.vmem [shape: f32[5,32,32], index: 6, kind: input, shape index: {}]   ;;  %s3317_s7 = inlined_call_operand.vmem [shape: f32[5,32,1], index: 7, kind: input, shape index: {}]   ;;  %s3318_s8 = inlined_call_operand.vmem [shape: f32[1,32], index: 8, kind: input, shape index: {}]   ;;  %s3319_s9 = inlined_call_operand.<no memory space> [shape: f32[1,1], index: 9, kind: input, shape index: {}]   ;;  %s3320_s10 = inlined_call_operand.hbm [shape: f32[2,1,256], index: 10, kind: output, shape index: {}]  }
   0x1   :  { %v15_v0 = vstv %s3319_s9 }
   0x2   :  { %16 = vst [vmem:[#allocation2] sm:$0x1] %v15_v0 }
   0x3   :  { %17 = vsyncpa [#allocation4], 0 }
   0x4   :  { %19 = vsyncpa [#allocation4 + $0x1], 0  ;;  %s2851_s15 = smov 0   ;;  %s2853_s16 = smov 0  }
   0x5   :  { %s2855_s17 = smov 0   ;;  %s2857_s18 = smov 0  }
   0x6   :  { %s2859_s19 = smov 0   ;;  %s2861_s20 = smov 0  }
   0x7   :  { %s2863_s21 = smov 0   ;;  %s2865_s22 = smov 0  }
   0x8 LB: > { %3327 = sst [smem:[#allocation6_spill]] %s2766_s17  ;;  %s2149_s9 = sadd.s32 4294967295, %s2786_s22   ;;  %s2786_s22 = sphi %s2865_s22, %s25_s22   ;;  %s2782_s21 = sphi %s2863_s21, %s3342_s21   ;;  %s2778_s20 = sphi %s2861_s20, %s3345_s20   ;;  %s2774_s19 = sphi %s2859_s19, %s3340_s19   ;;  %s2770_s18 = sphi %s2857_s18, %s3339_s18   ;;  %s2766_s17 = sphi %s2855_s17, %s3338_s17   ;;  %s2762_s16 = sphi %s2853_s16, %s3344_s16   ;;  %s2758_s15 = sphi %s2851_s15, %s3343_s15  }
   0x9   : > { %3328 = sst [smem:[#allocation7_spill]] %s2778_s20  ;;  %s2150_s23 = sadd.s32 4294967294, %s2786_s22  }
   0xa   : > { %3329 = sst [smem:[#allocation8_spill]] %s2782_s21  ;;  %s34_s24 = sadd.s32 1, %s2778_s20 }
   0xb   : > { %p35_p0 = scmp.ge.s32.totalorder %s34_s24, 2  ;;  %s37_s25 = sadd.s32 1, %s2782_s21 }
   0xc   : > { %p283_p1 = scmp.ne.s32.totalorder %s2766_s17, %s2762_s16  ;;  %p284_p2 = scmp.eq.s32.totalorder %s2149_s9, 3 }
   0xd   : > { %s3347_s24 = smov (%p35_p0, %s34_s24), 0  ;;  %s3349_s25 = smov (!%p35_p0, %s37_s25), %s2782_s21 }
   0xe   : > { %3330 = sst [smem:[#allocation9_spill]] %s3347_s24  ;;  %s269_s26 = ssub.s32 %s2778_s20, %s3347_s24 }
   0xf   : > { %p2902_p3 = por %p284_p2, %p283_p1  ;;  %p39_p4 = scmp.ge.s32.totalorder %s3349_s25, 2 }
  0x10   : > { %p289_p5 = scmp.ne.s32.totalorder %s2762_s16, %s2758_s15  ;;  %p290_p6 = scmp.eq.s32.totalorder %s2150_s23, 3 }
  0x11   : > { %p2153_p7 = scmp.ge.s32.totalorder %s2786_s22, 1  ;;  %s3351_s25 = smov (%p39_p4, %s3349_s25), 0 }
  0x12   : > { %3332 = sst [smem:[#allocation10_spill]] %s3351_s25  ;;  %p2911_p8 = por %p290_p6, %p289_p5 }
  0x13   : > { %p356_p9 = scmp.lt.s32.totalorder %s2786_s22, 5  ;;  %s268_s29 = ssub.s32 %s2782_s21, %s3351_s25 }
  0x14   : > { %s3333_s28 = scalar_select %p2911_p8, 1, 0 }
  0x15   : > { %s273_s30 = sadd.s32 1, %s2766_s17  ;;  %s270_s11 = sor.u32 %s269_s26, %s268_s29 }
  0x16   : > { %3334 = sst [smem:[#allocation11_spill]] %s3333_s28  ;;  %p357_p10 = pnand %p2153_p7, %p356_p9 }
  0x17   : > { %p271_p11 = scmp.eq.s32.totalorder %s270_s11, 0  ;;  %v434_v1 = vld [vmem:[%s3313_s3 + $0x10] sm:$0xff] (!%p357_p10)  ;;  %v432_v2 = vld [vmem:[%s3313_s3] sm:$0xff] (!%p357_p10)  ;;  %p406_p12 = scmp.lt.s32.totalorder (!%p357_p10), %s2774_s19, 1  ;;  %v2788_v3 = vmov (!%p357_p10), 0   ;;  %v435_v4 = vld [vmem:[%s3313_s3 + $0x18] sm:$0xff] (!%p357_p10) }
  0x18   : > { %360 = sbr.rel (%p357_p10) target bundleno = 2804 (0xaf4), region = 60  ;;  %p408_p13 = scmp.lt.s32.totalorder (!%p357_p10), %s2770_s18, 1  ;;  %2687 = vset.pattern.permute.xlu1 (!%p357_p10), %v2788_v3  ;;  %2686 = vset.pattern.permute.xlu0 (!%p357_p10), %v2788_v3  ;;  %v433_v5 = vld [vmem:[%s3313_s3 + $0x8] sm:$0xff] (!%p357_p10)  ;;  %vm472_vm0 = vcmask (!%p357_p10), 23552   ;;  %vm440_vm1 = vcmask (!%p357_p10), 1042432   ;;  %v605_v18 = vld [vmem:[%s3315_s5] sm:$0xff] (!%p357_p10) }
  0x19   : > { %s2920_s12 = scalar_select %p271_p11, %s2766_s17, %s273_s30  }
  0x1a   : > { %460 = vperm.xlu1 (!%p357_p10), %2687, %v434_v1   ;;  %450 = vperm.xlu0 (!%p357_p10), %2686, %v432_v2   ;;  %v606_v17 = vld [vmem:[%s3315_s5 + $0x8] sm:$0xff] (!%p357_p10)  ;;  %v608_v19 = vld [vmem:[%s3315_s5 + $0x18] sm:$0xff] (!%p357_p10)  ;;  %v607_v20 = vld [vmem:[%s3315_s5 + $0x10] sm:$0xff] (!%p357_p10)  ;;  %vm629_vm2 = vcmask (!%p357_p10), 261120   ;;  %vm2790_vm3 = vmmov (!%p357_p10), 0   ;;  %s2270_s11 = sshll.u32 (!%p357_p10), %s2774_s19, 1 }
  0x1b   : > { %3335 = sst [smem:[#allocation12_spill]] %s2920_s12  ;;  %v837_v21 = vld [vmem:[%s3317_s7 + $0x8] sm:$0xff] (!%p357_p10)  ;;  %v836_v22 = vld [vmem:[%s3317_s7] sm:$0xff] (!%p357_p10)  ;;  %v839_v23 = vld [vmem:[%s3317_s7 + $0x18] sm:$0xff] (!%p357_p10) }
  0x1c   : > { %v838_v24 = vld [vmem:[%s3317_s7 + $0x10] sm:$0xff] (!%p357_p10)  ;;  %v2178_v25 = vld [vmem:[%s3315_s5 + $0x28] sm:$0xff] (!%p357_p10)  ;;  %v2177_v26 = vld [vmem:[%s3315_s5 + $0x20] sm:$0xff] (!%p357_p10) }
  0x1d   : > { %v2180_v27 = vld [vmem:[%s3315_s5 + $0x38] sm:$0xff] (!%p357_p10)  ;;  %v2179_v28 = vld [vmem:[%s3315_s5 + $0x30] sm:$0xff] (!%p357_p10)  ;;  %v2194_v29 = vld [vmem:[%s3317_s7 + $0x28] sm:$0xff] (!%p357_p10) }
  0x1e   : > { %465 = vperm.xlu1 (!%p357_p10), %2687, %v435_v4   ;;  %455 = vperm.xlu0 (!%p357_p10), %2686, %v433_v5   ;;  %v2193_v30 = vld [vmem:[%s3317_s7 + $0x20] sm:$0xff] (!%p357_p10)  ;;  %v2196_v31 = vld [vmem:[%s3317_s7 + $0x38] sm:$0xff] (!%p357_p10)  ;;  %v2195_v32 = vld [vmem:[%s3317_s7 + $0x30] sm:$0xff] (!%p357_p10) }
  0x1f   : > { %s407_s26 = scalar_select %p406_p12, %s2774_s19, 1  ;;  %v2202_v33 = vld [vmem:[%s3315_s5 + $0x48] sm:$0xff]  ;;  %v2201_v34 = vld [vmem:[%s3315_s5 + $0x40] sm:$0xff]  ;;  %v2204_v35 = vld [vmem:[%s3315_s5 + $0x58] sm:$0xff] }
  0x20   : > { %s409_s14 = scalar_select %p408_p13, %s2770_s18, 1  ;;  %v2203_v36 = vld [vmem:[%s3315_s5 + $0x50] sm:$0xff]  ;;  %v2218_v37 = vld [vmem:[%s3317_s7 + $0x48] sm:$0xff]  ;;  %v2217_v38 = vld [vmem:[%s3317_s7 + $0x40] sm:$0xff] }
  0x21   : > { %s2154_s25 = sshll.u32 %s407_s26, 1  ;;  %s2274_s9 = sshll.u32 %s407_s26, 5  ;;  %v2220_v39 = vld [vmem:[%s3317_s7 + $0x58] sm:$0xff]  ;;  %v2219_v40 = vld [vmem:[%s3317_s7 + $0x50] sm:$0xff]  ;;  %v2226_v41 = vld [vmem:[%s3315_s5 + $0x68] sm:$0xff] }
  0x22   : > { %s411_s23 = sadd.s32 %s2154_s25, %s409_s14  ;;  %s423_s20 = scalar_lea.vmem %s3312_s2, %s2274_s9  ;;  %v2225_v42 = vld [vmem:[%s3315_s5 + $0x60] sm:$0xff]  ;;  %v2228_v43 = vld [vmem:[%s3315_s5 + $0x78] sm:$0xff]  ;;  %v2227_v44 = vld [vmem:[%s3315_s5 + $0x70] sm:$0xff] }
  0x23   : > { %s2155_s12 = sshll.u32 %s411_s23, 2  ;;  %s418_s30 = scalar_lea.vmem %s3311_s1, %s2274_s9  ;;  %v429_v6 = vld [vmem:[%s423_s20 + $0x8] sm:$0xff]  ;;  %v428_v7 = vld [vmem:[%s423_s20] sm:$0xff]  ;;  %v431_v14 = vld [vmem:[%s423_s20 + $0x18] sm:$0xff] }
  0x24   : > { %s413_s13 = scalar_lea.vmem %s3310_s0, %s2155_s12  ;;  %v424_v8 = vld [vmem:[%s418_s30] sm:$0xff]  ;;  %v425_v11 = vld [vmem:[%s418_s30 + $0x8] sm:$0xff]  ;;  %580 = vperm.xlu1 %2687, %v429_v6   ;;  %575 = vperm.xlu0 %2686, %v428_v7   ;;  %v426_v12 = vld [vmem:[%s418_s30 + $0x10] sm:$0xff] }
  0x25   : > { %v438_v9 = vld [vmem:[%s413_s13] sm:$0x7]  ;;  %2368 = vmatprep.mubr.msk.f32.mxu0 %vm472_vm0, %v424_v8  ;;  %v430_v15 = vld [vmem:[%s423_s20 + $0x10] sm:$0xff]  ;;  %v427_v16 = vld [vmem:[%s418_s30 + $0x18] sm:$0xff]  ;;  %s404_s30 = sand.u32 1, %s2762_s16   ;;  %s2047_s13 = sadd.s32 %s2770_s18, %s2270_s11 }
  0x26   : > { %v439_v10 = vmul.f32 %v438_v9, %v438_v9  ;;  %2366 = vmatprep.subr.msk.mxu0 %vm440_vm1, %v438_v9  ;;  %v2242_v45 = vld [vmem:[%s3317_s7 + $0x68] sm:$0xff]  ;;  %v2241_v46 = vld [vmem:[%s3317_s7 + $0x60] sm:$0xff]  ;;  %v2244_v47 = vld [vmem:[%s3317_s7 + $0x78] sm:$0xff]  ;;  %s2271_s17 = sshll.u32 %s2047_s13, 4  ;;  %s405_s21 = scalar_lea.vmem [#allocation3], %s404_s30 }
  0x27   : > { %2367 = vmatpush3.msk.msra.mxu0 %vm440_vm1, %v438_v9  ;;  %v2243_v48 = vld [vmem:[%s3317_s7 + $0x70] sm:$0xff]  ;;  %v2250_v49 = vld [vmem:[%s3315_s5 + $0x88] sm:$0xff]  ;;  %v2249_v50 = vld [vmem:[%s3315_s5 + $0x80] sm:$0xff]  ;;  %s2051_s24 = sshll.u32 %s405_s21, 4  ;;  %s3257_s28 = scalar_lea.hbm %s3320_s10, %s2271_s17  ;;  %s3259_s24 = int_to_ptr.vmem [resolvable:$true] %s2051_s24 }
  0x28   : > { %v2948_v13 = vsel %vm440_vm1, %v439_v10, 0.0  ;;  %2369 = vmatmul.mubr.msk.f32.vlgmr.msra.gmra.mrb[0].mxu0 %vm472_vm0, %v425_v11  ;;  %590 = vperm.xlu1 %2687, %v431_v14   ;;  %v2252_v51 = vld [vmem:[%s3315_s5 + $0x98] sm:$0xff]  ;;  %v2251_v52 = vld [vmem:[%s3315_s5 + $0x90] sm:$0xff]  ;;  %v2266_v53 = vld [vmem:[%s3317_s7 + $0x88] sm:$0xff]  ;;  %s2037_s12 = scalar_lea.sflag [#allocation4], %s404_s30  ;;  %s2692_s26 = scalar_lea.vmem %s3259_s24, 16 }
  0x29   : > { %2371 = vmatprep.mubr.msk.f32.mxu0 %vm472_vm0, %v426_v12  ;;  %585 = vperm.xlu0 %2686, %v430_v15   ;;  %v2265_v54 = vld [vmem:[%s3317_s7 + $0x80] sm:$0xff]  ;;  %v2268_v55 = vld [vmem:[%s3317_s7 + $0x98] sm:$0xff]  ;;  %v2267_v56 = vld [vmem:[%s3317_s7 + $0x90] sm:$0xff]  ;;  %v442_v59 = vrot.slane %v2948_v13, 4  ;;  %p2693_p0 = scmp.ne.s32.totalorder %s3259_s24, %s2692_s26  ;;  %s2792_s18 = smov [#allocation3]  }
  0x2a   : > { %v437_v57 = vld [vmem:[#allocation2] sm:$0x1]  ;;  %s2696_s19 = sshll.u32 %s2792_s18, 4  ;;  %s2697_s19 = int_to_ptr.vmem [resolvable:$false] %s2696_s19 }
  0x2b   : > { %v601_v58 = vld [vmem:[%s3314_s4] sm:$0xff]  ;;  %v443_v60 = vadd.f32 %v442_v59, %v2948_v13  ;;  %p2694_p1 = pnand %p2693_p0, %p2902_p3  ;;  %s2698_s14 = scalar_lea.vmem %s2697_s19, 32 }
  0x2c   : > { %2372 = vmatmul.mubr.msk.f32.gmra.mrb[2].mxu0 %vm472_vm0, %v427_v16  ;;  %616 = vperm.xlu1 %2687, %v606_v17   ;;  %p2699_p4 = scmp.lt.s32.totalorder %s3259_s24, %s2697_s19  ;;  %p2700_p5 = scmp.lt.s32.totalorder %s2698_s14, %s2692_s26 }
  0x2d   : > { %611 = vperm.xlu0 %2686, %v605_v18   ;;  %2382 = vmatprep.mubr.msk.f32.mxu1 %vm629_vm2, %v601_v58  ;;  %v444_v61 = vrot.slane %v443_v60, 2  ;;  %p2695_p2 = pneg %p2694_p1 }
  0x2e   : > { %p2701_p6 = por %p2700_p5, %p2699_p4 }
  0x2f   : > { %v445_v62 = vadd.f32 %v444_v61, %v443_v60 }
  0x30   : > { %626 = vperm.xlu1 %2687, %v608_v19   ;;  %p2702_p7 = pnand %p2701_p6, %p2695_p2 }
  0x31   : > { %621 = vperm.xlu0 %2686, %v607_v20   ;;  %v446_v1 = vrot.slane %v445_v62, 1 }
  0x33   : > { %v447_v3 = vadd.f32 %v446_v1, %v445_v62 }
  0x34   : > { %847 = vperm.xlu1 %2687, %v837_v21  }
  0x35   : > { %842 = vperm.xlu0 %2686, %v836_v22  }
  0x38   : > { %857 = vperm.xlu1 %2687, %v839_v23  }
  0x39   : > { %852 = vperm.xlu0 %2686, %v838_v24  }
  0x3c   : > { %885 = vperm.xlu1 %2687, %v2178_v25  }
  0x3d   : > { %880 = vperm.xlu0 %2686, %v2177_v26  }
  0x40   : > { %895 = vperm.xlu1 %2687, %v2180_v27  }
  0x41   : > { %890 = vperm.xlu0 %2686, %v2179_v28  }
  0x44   : > { %1117 = vperm.xlu1 %2687, %v2194_v29  }
  0x45   : > { %1112 = vperm.xlu0 %2686, %v2193_v30  }
  0x48   : > { %1127 = vperm.xlu1 %2687, %v2196_v31   ;;  %v602_v31 = vld [vmem:[%s3314_s4 + $0x8] sm:$0xff] }
  0x49   : > { %1122 = vperm.xlu0 %2686, %v2195_v32   ;;  %v603_v32 = vld [vmem:[%s3314_s4 + $0x10] sm:$0xff] }
  0x4c   : > { %1155 = vperm.xlu1 %2687, %v2202_v33   ;;  %v604_v33 = vld [vmem:[%s3314_s4 + $0x18] sm:$0xff] }
  0x4d   : > { %1150 = vperm.xlu0 %2686, %v2201_v34   ;;  %v731_v34 = vld [vmem:[%s3316_s6] sm:$0xff] }
  0x4e   : > { %2396 = vmatprep.mubr.msk.f32.mxu0 %vm629_vm2, %v731_v34 }
  0x50   : > { %1165 = vperm.xlu1 %2687, %v2204_v35  }
  0x51   : > { %1160 = vperm.xlu0 %2686, %v2203_v36  }
  0x54   : > { %1387 = vperm.xlu1 %2687, %v2218_v37  }
  0x55   : > { %1382 = vperm.xlu0 %2686, %v2217_v38  }
  0x58   : > { %1397 = vperm.xlu1 %2687, %v2220_v39  }
  0x59   : > { %1392 = vperm.xlu0 %2686, %v2219_v40  }
  0x5c   : > { %1425 = vperm.xlu1 %2687, %v2226_v41  }
  0x5d   : > { %1420 = vperm.xlu0 %2686, %v2225_v42  }
  0x60   : > { %1435 = vperm.xlu1 %2687, %v2228_v43  }
  0x61   : > { %1430 = vperm.xlu0 %2686, %v2227_v44  }
  0x64   : > { %1657 = vperm.xlu1 %2687, %v2242_v45  }
  0x65   : > { %1652 = vperm.xlu0 %2686, %v2241_v46  }
  0x68   : > { %1667 = vperm.xlu1 %2687, %v2244_v47  }
  0x69   : > { %1662 = vperm.xlu0 %2686, %v2243_v48  }
  0x6c   : > { %1695 = vperm.xlu1 %2687, %v2250_v49  }
  0x6d   : > { %1690 = vperm.xlu0 %2686, %v2249_v50  }
  0x70   : > { %1705 = vperm.xlu1 %2687, %v2252_v51  }
  0x71   : > { %1700 = vperm.xlu0 %2686, %v2251_v52  }
  0x74   : > { %1927 = vperm.xlu1 %2687, %v2266_v53   ;;  %v732_v53 = vld [vmem:[%s3316_s6 + $0x8] sm:$0xff] }
  0x75   : > { %1922 = vperm.xlu0 %2686, %v2265_v54   ;;  %v733_v54 = vld [vmem:[%s3316_s6 + $0x10] sm:$0xff] }
  0x78   : > { %1937 = vperm.xlu1 %2687, %v2268_v55   ;;  %v734_v55 = vld [vmem:[%s3316_s6 + $0x18] sm:$0xff] }
  0x79   : > { %1932 = vperm.xlu0 %2686, %v2267_v56   ;;  %v2173_v56 = vld [vmem:[%s3314_s4 + $0x20] sm:$0xff] }
  0x7d   : > { %1950 = vperm.xlu0 %2686, %v437_v57  }
  0x99   : > { %v461_v63 = vpop.permute.xlu1 %460  ;;  %v451_v0 = vpop.permute.xlu0 %450 }
  0x9a   : > { %v468_v6 = vmul.f32 %v451_v0, %v447_v3  ;;  %v470_v16 = vmul.f32 %v461_v63, %v447_v3 }
  0x9d   : > { %v466_v2 = vpop.permute.xlu1 %465  ;;  %v456_v4 = vpop.permute.xlu0 %455 }
  0x9e   : > { %v469_v5 = vmul.f32 %v456_v4, %v447_v3  ;;  %v471_v14 = vmul.f32 %v466_v2, %v447_v3 }
  0xa3   : > { %v581_v7 = vpop.permute.xlu1 %580  ;;  %v576_v9 = vpop.permute.xlu0 %575 }
  0xa7   : > { %v591_v21 = vpop.permute.xlu1 %590 }
  0xa8   : > { %v586_v24 = vpop.permute.xlu0 %585 }
  0xab   : > { %v617_v35 = vpop.permute.xlu1 %616 }
  0xac   : > { %v612_v36 = vpop.permute.xlu0 %611 }
  0xaf   : > { %v627_v42 = vpop.permute.xlu1 %626 }
  0xb0   : > { %v622_v45 = vpop.permute.xlu0 %621 }
  0xb3   : > { %v848_v57 = vpop.permute.xlu1 %847 }
  0xb4   : > { %v843_v59 = vpop.permute.xlu0 %842 }
  0xfb   : > { %v2370_v8 = vpop.f32.mrb[0].mxu0 }
  0xfc   : > { %v560_v10 = vadd.f32 %v2370_v8, %v469_v5  ;;  %v554_v11 = vpop.f32.mrb[1].mxu0  ;;  %v858_v5 = vpop.permute.xlu1 %857 }
  0xfd   : > { %v555_v12 = vadd.f32 %v554_v11, %v468_v6  ;;  %v853_v8 = vpop.permute.xlu0 %852 }
  0xfe   : > { %v594_v15 = vadd.f32 %v581_v7, %v560_v10 }
  0xff   : > { %v593_v13 = vadd.f32 %v576_v9, %v555_v12  ;;  %v2373_v17 = vpop.f32.mrb[2].mxu0 }
 0x100   : > { %v570_v18 = vadd.f32 %v2373_v17, %v471_v14  ;;  %v564_v19 = vpop.f32.mrb[3].mxu0  ;;  %v598_v20 = vmax.f32 %v594_v15, 0.0  ;;  %v2176_v17 = vld [vmem:[%s3314_s4 + $0x38] sm:$0xff] }
 0x101   : > { %v565_v22 = vadd.f32 %v564_v19, %v470_v16  ;;  %v597_v23 = vmax.f32 %v593_v13, 0.0  ;;  %v2174_v16 = vld [vmem:[%s3314_s4 + $0x28] sm:$0xff]  ;;  %v886_v19 = vpop.permute.xlu1 %885 }
 0x102   : > { %v596_v25 = vadd.f32 %v591_v21, %v570_v18  ;;  %v2185_v18 = vld [vmem:[%s3316_s6 + $0x20] sm:$0xff] }
 0x103   : > { %v595_v26 = vadd.f32 %v586_v24, %v565_v22  ;;  %v2525_v27 = vpack.c.bf16 %v598_v20, %v597_v23  ;;  %v881_v20 = vpop.permute.xlu0 %880 }
 0x104   : > { %v600_v28 = vmax.f32 %v596_v25, 0.0 }
 0x105   : > { %v599_v29 = vmax.f32 %v595_v26, 0.0  ;;  %2526 = vmatprep.subr.bf16.mxu1 %v2525_v27 }
 0x106   : > { %2528 = vmatpush3.bf16.msra.mxu1 %v2525_v27 }
 0x107   : > { %v2529_v30 = vpack.c.bf16 %v600_v28, %v599_v29  ;;  %v891_v29 = vpop.permute.xlu0 %890 }
 0x109   : > { %2530 = vmatprep.subr.bf16.mxu1 %v2529_v30 }
 0x10a   : > { %2532 = vmatpush3.bf16.msra.mxu1 %v2529_v30 }
 0x10d   : > { %2383 = vmatmul.mubr.msk.f32.vlgmr.msra.gmra.mrb[0].mxu1 %vm629_vm2, %v602_v31 }
 0x10e   : > { %2385 = vmatprep.mubr.msk.f32.mxu1 %vm629_vm2, %v603_v32 }
 0x111   : > { %2386 = vmatmul.mubr.msk.f32.gmra.mrb[2].mxu1 %vm629_vm2, %v604_v33 }
 0x112   : > { %2410 = vmatprep.mubr.msk.f32.mxu1 %vm629_vm2, %v2173_v56 }
 0x1e0   : > { %v2384_v37 = vpop.f32.mrb[0].mxu1 }
 0x1e1   : > { %v714_v38 = vadd.f32 %v2384_v37, %v617_v35  ;;  %v708_v39 = vpop.f32.mrb[1].mxu1  ;;  %v2186_v37 = vld [vmem:[%s3316_s6 + $0x28] sm:$0xff] }
 0x1e2   : > { %v709_v40 = vadd.f32 %v708_v39, %v612_v36  ;;  %v2188_v39 = vld [vmem:[%s3316_s6 + $0x38] sm:$0xff] }
 0x1e3   : > { %v728_v41 = vmax.f32 %v714_v38, 0.0  ;;  %v2187_v38 = vld [vmem:[%s3316_s6 + $0x30] sm:$0xff] }
 0x1e4   : > { %v727_v43 = vmax.f32 %v709_v40, 0.0  ;;  %v2387_v44 = vpop.f32.mrb[2].mxu1  ;;  %v2197_v40 = vld [vmem:[%s3314_s4 + $0x40] sm:$0xff] }
 0x1e5   : > { %v724_v46 = vadd.f32 %v2387_v44, %v627_v42  ;;  %v718_v47 = vpop.f32.mrb[3].mxu1 }
 0x1e6   : > { %v2533_v48 = vpack.c.bf16 %v728_v41, %v727_v43  ;;  %v719_v49 = vadd.f32 %v718_v47, %v622_v45  ;;  %v1113_v43 = vpop.permute.xlu0 %1112 }
 0x1e7   : > { %v730_v50 = vmax.f32 %v724_v46, 0.0 }
 0x1e8   : > { %v729_v51 = vmax.f32 %v719_v49, 0.0  ;;  %2534 = vmatprep.subr.bf16.mxu0 %v2533_v48 }
 0x1e9   : > { %2536 = vmatpush3.bf16.msra.mxu0 %v2533_v48 }
 0x1ea   : > { %v2537_v52 = vpack.c.bf16 %v730_v50, %v729_v51  ;;  %v1123_v56 = vpop.permute.xlu0 %1122 }
 0x1ec   : > { %2538 = vmatprep.subr.bf16.mxu0 %v2537_v52 }
 0x1ed   : > { %2540 = vmatpush3.bf16.msra.mxu0 %v2537_v52 }
 0x1f0   : > { %2397 = vmatmul.mubr.msk.f32.vlgmr.msra.gmra.mrb[4].mxu0 %vm629_vm2, %v732_v53 }
 0x1f1   : > { %2399 = vmatprep.mubr.msk.f32.mxu0 %vm629_vm2, %v733_v54 }
 0x1f4   : > { %2400 = vmatmul.mubr.msk.f32.gmra.mrb[6].mxu0 %vm629_vm2, %v734_v55 }
 0x1f5   : > { %2424 = vmatprep.mubr.msk.f32.mxu0 %vm629_vm2, %v2185_v18 }
 0x2c3   : > { %v2398_v58 = vpop.f32.mrb[4].mxu0 }
 0x2c4   : > { %v833_v60 = vadd.f32 %v2398_v58, %v594_v15  ;;  %v813_v61 = vpop.f32.mrb[5].mxu0 }
 0x2c5   : > { %v832_v62 = vadd.f32 %v813_v61, %v593_v13  ;;  %v2175_v13 = vld [vmem:[%s3314_s4 + $0x30] sm:$0xff] }
 0x2c6   : > { %v861_v63 = vadd.f32 %v848_v57, %v833_v60 }
 0x2c7   : > { %v860_v0 = vadd.f32 %v843_v59, %v832_v62  ;;  %v2401_v1 = vpop.f32.mrb[6].mxu0 }
 0x2c8   : > { %v865_v2 = vmax.f32 %v861_v63, 0.0  ;;  %v835_v3 = vadd.f32 %v2401_v1, %v596_v25  ;;  %v823_v4 = vpop.f32.mrb[7].mxu0  ;;  %v2200_v1 = vld [vmem:[%s3314_s4 + $0x58] sm:$0xff] }
 0x2c9   : > { %v864_v6 = vmax.f32 %v860_v0, 0.0  ;;  %v834_v7 = vadd.f32 %v823_v4, %v595_v26  ;;  %v896_v26 = vpop.permute.xlu1 %895  ;;  %v1151_v4 = vpop.permute.xlu0 %1150 }
 0x2ca   : > { %v863_v9 = vadd.f32 %v858_v5, %v835_v3 }
 0x2cb   : > { %v862_v10 = vadd.f32 %v853_v8, %v834_v7  ;;  %v2541_v11 = vpack.c.bf16 %v865_v2, %v864_v6  ;;  %v2209_v2 = vld [vmem:[%s3316_s6 + $0x40] sm:$0xff] }
 0x2cc   : > { %v867_v12 = vmax.f32 %v863_v9, 0.0 }
 0x2cd   : > { %v866_v14 = vmax.f32 %v862_v10, 0.0  ;;  %2542 = vmatprep.subr.bf16.mxu1 %v2541_v11  ;;  %v1118_v41 = vpop.permute.xlu1 %1117 }
 0x2ce   : > { %2544 = vmatpush3.bf16.msra.mxu1 %v2541_v11 }
 0x2cf   : > { %v2545_v15 = vpack.c.bf16 %v867_v12, %v866_v14  ;;  %v1161_v14 = vpop.permute.xlu0 %1160 }
 0x2d1   : > { %2546 = vmatprep.subr.bf16.mxu1 %v2545_v15  ;;  %v1128_v53 = vpop.permute.xlu1 %1127 }
 0x2d2   : > { %2548 = vmatpush3.bf16.msra.mxu1 %v2545_v15 }
 0x2d5   : > { %2411 = vmatmul.mubr.msk.f32.vlgmr.msra.gmra.mrb[4].mxu1 %vm629_vm2, %v2174_v16  ;;  %v1156_v3 = vpop.permute.xlu1 %1155 }
 0x2d6   : > { %2413 = vmatprep.mubr.msk.f32.mxu1 %vm629_vm2, %v2175_v13 }
 0x2d9   : > { %2414 = vmatmul.mubr.msk.f32.gmra.mrb[6].mxu1 %vm629_vm2, %v2176_v17 }
 0x2da   : > { %2438 = vmatprep.mubr.msk.f32.mxu1 %vm629_vm2, %v2197_v40 }
 0x3a8   : > { %v2412_v21 = vpop.f32.mrb[4].mxu1 }
 0x3a9   : > { %v982_v22 = vadd.f32 %v2412_v21, %v886_v19  ;;  %v976_v23 = vpop.f32.mrb[5].mxu1  ;;  %v2210_v21 = vld [vmem:[%s3316_s6 + $0x48] sm:$0xff] }
 0x3aa   : > { %v977_v24 = vadd.f32 %v976_v23, %v881_v20  ;;  %v2212_v23 = vld [vmem:[%s3316_s6 + $0x58] sm:$0xff] }
 0x3ab   : > { %v996_v25 = vmax.f32 %v982_v22, 0.0  ;;  %v2211_v22 = vld [vmem:[%s3316_s6 + $0x50] sm:$0xff] }
 0x3ac   : > { %v995_v27 = vmax.f32 %v977_v24, 0.0  ;;  %v2415_v28 = vpop.f32.mrb[6].mxu1  ;;  %v2221_v24 = vld [vmem:[%s3314_s4 + $0x60] sm:$0xff] }
 0x3ad   : > { %v992_v30 = vadd.f32 %v2415_v28, %v896_v26  ;;  %v986_v31 = vpop.f32.mrb[7].mxu1 }
 0x3ae   : > { %v2549_v32 = vpack.c.bf16 %v996_v25, %v995_v27  ;;  %v987_v33 = vadd.f32 %v986_v31, %v891_v29  ;;  %v1383_v27 = vpop.permute.xlu0 %1382 }
 0x3af   : > { %v998_v34 = vmax.f32 %v992_v30, 0.0 }
 0x3b0   : > { %v997_v35 = vmax.f32 %v987_v33, 0.0  ;;  %2550 = vmatprep.subr.bf16.mxu0 %v2549_v32 }
 0x3b1   : > { %2552 = vmatpush3.bf16.msra.mxu0 %v2549_v32 }
 0x3b2   : > { %v2553_v36 = vpack.c.bf16 %v998_v34, %v997_v35  ;;  %v1393_v40 = vpop.permute.xlu0 %1392 }
 0x3b4   : > { %2554 = vmatprep.subr.bf16.mxu0 %v2553_v36 }
 0x3b5   : > { %2556 = vmatpush3.bf16.msra.mxu0 %v2553_v36 }
 0x3b8   : > { %2425 = vmatmul.mubr.msk.f32.vlgmr.msra.gmra.mrb[8].mxu0 %vm629_vm2, %v2186_v37 }
 0x3b9   : > { %2427 = vmatprep.mubr.msk.f32.mxu0 %vm629_vm2, %v2187_v38 }
 0x3bc   : > { %2428 = vmatmul.mubr.msk.f32.gmra.mrb[10].mxu0 %vm629_vm2, %v2188_v39 }
 0x3bd   : > { %2452 = vmatprep.mubr.msk.f32.mxu0 %vm629_vm2, %v2209_v2 }
 0x48b   : > { %v2426_v42 = vpop.f32.mrb[8].mxu0 }
 0x48c   : > { %v1102_v44 = vadd.f32 %v2426_v42, %v861_v63  ;;  %v1082_v45 = vpop.f32.mrb[9].mxu0  ;;  %v2198_v63 = vld [vmem:[%s3314_s4 + $0x48] sm:$0xff] }
 0x48d   : > { %v1101_v46 = vadd.f32 %v1082_v45, %v860_v0  ;;  %v2199_v0 = vld [vmem:[%s3314_s4 + $0x50] sm:$0xff] }
 0x48e   : > { %v1131_v47 = vadd.f32 %v1118_v41, %v1102_v44 }
 0x48f   : > { %v1130_v48 = vadd.f32 %v1113_v43, %v1101_v46  ;;  %v2429_v49 = vpop.f32.mrb[10].mxu0 }
 0x490   : > { %v1135_v50 = vmax.f32 %v1131_v47, 0.0  ;;  %v1104_v51 = vadd.f32 %v2429_v49, %v863_v9  ;;  %v1092_v52 = vpop.f32.mrb[11].mxu0  ;;  %v2224_v49 = vld [vmem:[%s3314_s4 + $0x78] sm:$0xff] }
 0x491   : > { %v1134_v54 = vmax.f32 %v1130_v48, 0.0  ;;  %v1103_v55 = vadd.f32 %v1092_v52, %v862_v10  ;;  %v1166_v10 = vpop.permute.xlu1 %1165  ;;  %v1421_v52 = vpop.permute.xlu0 %1420 }
 0x492   : > { %v1133_v57 = vadd.f32 %v1128_v53, %v1104_v51 }
 0x493   : > { %v1132_v58 = vadd.f32 %v1123_v56, %v1103_v55  ;;  %v2557_v59 = vpack.c.bf16 %v1135_v50, %v1134_v54  ;;  %v2233_v50 = vld [vmem:[%s3316_s6 + $0x60] sm:$0xff] }
 0x494   : > { %v1137_v60 = vmax.f32 %v1133_v57, 0.0 }
 0x495   : > { %v1136_v61 = vmax.f32 %v1132_v58, 0.0  ;;  %2558 = vmatprep.subr.bf16.mxu1 %v2557_v59  ;;  %v1388_v25 = vpop.permute.xlu1 %1387 }
 0x496   : > { %2560 = vmatpush3.bf16.msra.mxu1 %v2557_v59 }
 0x497   : > { %v2561_v62 = vpack.c.bf16 %v1137_v60, %v1136_v61  ;;  %v1431_v61 = vpop.permute.xlu0 %1430 }
 0x499   : > { %2562 = vmatprep.subr.bf16.mxu1 %v2561_v62  ;;  %v1398_v37 = vpop.permute.xlu1 %1397 }
 0x49a   : > { %2564 = vmatpush3.bf16.msra.mxu1 %v2561_v62 }
 0x49d   : > { %2439 = vmatmul.mubr.msk.f32.vlgmr.msra.gmra.mrb[8].mxu1 %vm629_vm2, %v2198_v63  ;;  %v1426_v51 = vpop.permute.xlu1 %1425 }
 0x49e   : > { %2441 = vmatprep.mubr.msk.f32.mxu1 %vm629_vm2, %v2199_v0 }
 0x4a1   : > { %2442 = vmatmul.mubr.msk.f32.gmra.mrb[10].mxu1 %vm629_vm2, %v2200_v1 }
 0x4a2   : > { %2466 = vmatprep.mubr.msk.f32.mxu1 %vm629_vm2, %v2221_v24 }
 0x570   : > { %v2440_v5 = vpop.f32.mrb[8].mxu1 }
 0x571   : > { %v1252_v6 = vadd.f32 %v2440_v5, %v1156_v3  ;;  %v1246_v7 = vpop.f32.mrb[9].mxu1  ;;  %v2234_v5 = vld [vmem:[%s3316_s6 + $0x68] sm:$0xff] }
 0x572   : > { %v1247_v8 = vadd.f32 %v1246_v7, %v1151_v4  ;;  %v2236_v7 = vld [vmem:[%s3316_s6 + $0x78] sm:$0xff] }
 0x573   : > { %v1266_v9 = vmax.f32 %v1252_v6, 0.0  ;;  %v2235_v6 = vld [vmem:[%s3316_s6 + $0x70] sm:$0xff] }
 0x574   : > { %v1265_v11 = vmax.f32 %v1247_v8, 0.0  ;;  %v2443_v12 = vpop.f32.mrb[10].mxu1  ;;  %v2245_v8 = vld [vmem:[%s3314_s4 + $0x80] sm:$0xff] }
 0x575   : > { %v1262_v15 = vadd.f32 %v2443_v12, %v1166_v10  ;;  %v1256_v16 = vpop.f32.mrb[11].mxu1 }
 0x576   : > { %v2565_v13 = vpack.c.bf16 %v1266_v9, %v1265_v11  ;;  %v1257_v17 = vadd.f32 %v1256_v16, %v1161_v14  ;;  %v1653_v11 = vpop.permute.xlu0 %1652 }
 0x577   : > { %v1268_v18 = vmax.f32 %v1262_v15, 0.0 }
 0x578   : > { %v1267_v19 = vmax.f32 %v1257_v17, 0.0  ;;  %2566 = vmatprep.subr.bf16.mxu0 %v2565_v13 }
 0x579   : > { %2568 = vmatpush3.bf16.msra.mxu0 %v2565_v13 }
 0x57a   : > { %v2569_v20 = vpack.c.bf16 %v1268_v18, %v1267_v19  ;;  %v1663_v24 = vpop.permute.xlu0 %1662 }
 0x57c   : > { %2570 = vmatprep.subr.bf16.mxu0 %v2569_v20 }
 0x57d   : > { %2572 = vmatpush3.bf16.msra.mxu0 %v2569_v20 }
 0x580   : > { %2453 = vmatmul.mubr.msk.f32.vlgmr.msra.gmra.mrb[12].mxu0 %vm629_vm2, %v2210_v21 }
 0x581   : > { %2455 = vmatprep.mubr.msk.f32.mxu0 %vm629_vm2, %v2211_v22 }
 0x584   : > { %2456 = vmatmul.mubr.msk.f32.gmra.mrb[14].mxu0 %vm629_vm2, %v2212_v23 }
 0x585   : > { %2480 = vmatprep.mubr.msk.f32.mxu0 %vm629_vm2, %v2233_v50 }
 0x653   : > { %v2454_v26 = vpop.f32.mrb[12].mxu0 }
 0x654   : > { %v1372_v28 = vadd.f32 %v2454_v26, %v1131_v47  ;;  %v1352_v29 = vpop.f32.mrb[13].mxu0  ;;  %v2222_v47 = vld [vmem:[%s3314_s4 + $0x68] sm:$0xff] }
 0x655   : > { %v1371_v30 = vadd.f32 %v1352_v29, %v1130_v48  ;;  %v2223_v48 = vld [vmem:[%s3314_s4 + $0x70] sm:$0xff] }
 0x656   : > { %v1401_v31 = vadd.f32 %v1388_v25, %v1372_v28 }
 0x657   : > { %v1400_v32 = vadd.f32 %v1383_v27, %v1371_v30  ;;  %v2457_v33 = vpop.f32.mrb[14].mxu0 }
 0x658   : > { %v1405_v34 = vmax.f32 %v1401_v31, 0.0  ;;  %v1374_v35 = vadd.f32 %v2457_v33, %v1133_v57  ;;  %v1362_v36 = vpop.f32.mrb[15].mxu0  ;;  %v2248_v33 = vld [vmem:[%s3314_s4 + $0x98] sm:$0xff] }
 0x659   : > { %v1404_v38 = vmax.f32 %v1400_v32, 0.0  ;;  %v1373_v39 = vadd.f32 %v1362_v36, %v1132_v58  ;;  %v1436_v58 = vpop.permute.xlu1 %1435  ;;  %v1691_v36 = vpop.permute.xlu0 %1690 }
 0x65a   : > { %v1403_v41 = vadd.f32 %v1398_v37, %v1374_v35 }
 0x65b   : > { %v1402_v42 = vadd.f32 %v1393_v40, %v1373_v39  ;;  %v2573_v43 = vpack.c.bf16 %v1405_v34, %v1404_v38  ;;  %v2257_v34 = vld [vmem:[%s3316_s6 + $0x80] sm:$0xff] }
 0x65c   : > { %v1407_v44 = vmax.f32 %v1403_v41, 0.0 }
 0x65d   : > { %v1406_v45 = vmax.f32 %v1402_v42, 0.0  ;;  %2574 = vmatprep.subr.bf16.mxu1 %v2573_v43  ;;  %v1658_v9 = vpop.permute.xlu1 %1657 }
 0x65e   : > { %2576 = vmatpush3.bf16.msra.mxu1 %v2573_v43 }
 0x65f   : > { %v2577_v46 = vpack.c.bf16 %v1407_v44, %v1406_v45  ;;  %v1701_v45 = vpop.permute.xlu0 %1700 }
 0x661   : > { %2578 = vmatprep.subr.bf16.mxu1 %v2577_v46  ;;  %v1668_v21 = vpop.permute.xlu1 %1667 }
 0x662   : > { %2580 = vmatpush3.bf16.msra.mxu1 %v2577_v46 }
 0x665   : > { %2467 = vmatmul.mubr.msk.f32.vlgmr.msra.gmra.mrb[12].mxu1 %vm629_vm2, %v2222_v47  ;;  %v1696_v35 = vpop.permute.xlu1 %1695 }
 0x666   : > { %2469 = vmatprep.mubr.msk.f32.mxu1 %vm629_vm2, %v2223_v48 }
 0x669   : > { %2470 = vmatmul.mubr.msk.f32.gmra.mrb[14].mxu1 %vm629_vm2, %v2224_v49 }
 0x66a   : > { %2494 = vmatprep.mubr.msk.f32.mxu1 %vm629_vm2, %v2245_v8 }
 0x738   : > { %v2468_v53 = vpop.f32.mrb[12].mxu1 }
 0x739   : > { %v1522_v54 = vadd.f32 %v2468_v53, %v1426_v51  ;;  %v1516_v55 = vpop.f32.mrb[13].mxu1  ;;  %v2258_v53 = vld [vmem:[%s3316_s6 + $0x88] sm:$0xff] }
 0x73a   : > { %v1517_v56 = vadd.f32 %v1516_v55, %v1421_v52  ;;  %v2260_v55 = vld [vmem:[%s3316_s6 + $0x98] sm:$0xff] }
 0x73b   : > { %v1536_v57 = vmax.f32 %v1522_v54, 0.0  ;;  %v2259_v54 = vld [vmem:[%s3316_s6 + $0x90] sm:$0xff] }
 0x73c   : > { %v1535_v59 = vmax.f32 %v1517_v56, 0.0  ;;  %v2471_v60 = vpop.f32.mrb[14].mxu1  ;;  %v2789_v56 = vmov 0.0|0.0  }
 0x73d   : > { %v1532_v62 = vadd.f32 %v2471_v60, %v1436_v58  ;;  %v1526_v63 = vpop.f32.mrb[15].mxu1  ;;  %v1923_v60 = vpop.permute.xlu0 %1922 }
 0x73e   : > { %v2581_v0 = vpack.c.bf16 %v1536_v57, %v1535_v59  ;;  %v1527_v1 = vadd.f32 %v1526_v63, %v1431_v61  ;;  %v2791_v57 = vmov 0.0  }
 0x73f   : > { %v1538_v2 = vmax.f32 %v1532_v62, 0.0 }
 0x740   : > { %v1537_v3 = vmax.f32 %v1527_v1, 0.0  ;;  %2582 = vmatprep.subr.bf16.mxu0 %v2581_v0 }
 0x741   : > { %2584 = vmatpush3.bf16.msra.mxu0 %v2581_v0 }
 0x742   : > { %v2585_v4 = vpack.c.bf16 %v1538_v2, %v1537_v3 }
 0x744   : > { %2586 = vmatprep.subr.bf16.mxu0 %v2585_v4 }
 0x745   : > { %2588 = vmatpush3.bf16.msra.mxu0 %v2585_v4 }
 0x748   : > { %2481 = vmatmul.mubr.msk.f32.vlgmr.msra.gmra.mrb[16].mxu0 %vm629_vm2, %v2234_v5 }
 0x749   : > { %2483 = vmatprep.mubr.msk.f32.mxu0 %vm629_vm2, %v2235_v6 }
 0x74c   : > { %2484 = vmatmul.mubr.msk.f32.gmra.mrb[18].mxu0 %vm629_vm2, %v2236_v7 }
 0x74d   : > { %2508 = vmatprep.mubr.msk.f32.mxu0 %vm629_vm2, %v2257_v34 }
 0x81b   : > { %v2482_v10 = vpop.f32.mrb[16].mxu0 }
 0x81c   : > { %v1642_v12 = vadd.f32 %v2482_v10, %v1401_v31  ;;  %v1622_v14 = vpop.f32.mrb[17].mxu0  ;;  %v2246_v31 = vld [vmem:[%s3314_s4 + $0x88] sm:$0xff] }
 0x81d   : > { %v1641_v15 = vadd.f32 %v1622_v14, %v1400_v32  ;;  %v2247_v32 = vld [vmem:[%s3314_s4 + $0x90] sm:$0xff] }
 0x81e   : > { %v3207_v16 = vadd.f32 %v1658_v9, %v1642_v12  ;;  %v1933_v9 = vpop.permute.xlu0 %1932 }
 0x81f   : > { %v3209_v13 = vadd.f32 %v1653_v11, %v1641_v15  ;;  %v2485_v17 = vpop.f32.mrb[18].mxu0 }
 0x820   : > { %v1675_v18 = vmax.f32 %v3207_v16, 0.0  ;;  %v1644_v19 = vadd.f32 %v2485_v17, %v1403_v41  ;;  %v1632_v20 = vpop.f32.mrb[19].mxu0  ;;  %v1953_v17 = vlaneseq }
 0x821   : > { %v1674_v22 = vmax.f32 %v3209_v13, 0.0  ;;  %v1643_v23 = vadd.f32 %v1632_v20, %v1402_v42  ;;  %v1706_v42 = vpop.permute.xlu1 %1705 }
 0x822   : > { %v1673_v25 = vadd.f32 %v1668_v21, %v1644_v19  ;;  %v1951_v20 = vpop.permute.xlu0 %1950 }
 0x823   : > { %v3213_v26 = vadd.f32 %v1663_v24, %v1643_v23  ;;  %v2589_v27 = vpack.c.bf16 %v1675_v18, %v1674_v22  ;;  %v1954_v18 = vshrl.u32 %v1953_v17, 7 }
 0x824   : > { %v1677_v28 = vmax.f32 %v1673_v25, 0.0 }
 0x825   : > { %v1676_v29 = vmax.f32 %v3213_v26, 0.0  ;;  %2590 = vmatprep.subr.bf16.mxu1 %v2589_v27  ;;  %v1928_v58 = vpop.permute.xlu1 %1927  ;;  %v1955_v19 = vsub.s32 0, %v1954_v18 }
 0x826   : > { %2592 = vmatpush3.bf16.msra.mxu1 %v2589_v27 }
 0x827   : > { %v2593_v30 = vpack.c.bf16 %v1677_v28, %v1676_v29  ;;  %v1956_v21 = vrot.slane %v1951_v20, %v1955_v19 }
 0x829   : > { %2594 = vmatprep.subr.bf16.mxu1 %v2593_v30  ;;  %v1938_v6 = vpop.permute.xlu1 %1937 }
 0x82a   : > { %2596 = vmatpush3.bf16.msra.mxu1 %v2593_v30 }
 0x82b   : > { %2605 = vmatprep.subr.bf16.mxu1 %v2789_v56 }
 0x82d   : > { %2495 = vmatmul.mubr.msk.f32.vlgmr.msra.gmra.mrb[16].mxu1 %vm629_vm2, %v2246_v31 }
 0x82e   : > { %2497 = vmatprep.mubr.msk.f32.mxu1 %vm629_vm2, %v2247_v32 }
 0x831   : > { %2498 = vmatmul.mubr.msk.f32.gmra.mrb[18].mxu1 %vm629_vm2, %v2248_v33 }
 0x832   : > { %2522 = vmatprep.mubr.msk.f32.mxu1 %vm2790_vm3, %v2791_v57 }
 0x900   : > { %v2496_v37 = vpop.f32.mrb[16].mxu1 }
 0x901   : > { %v1792_v38 = vadd.f32 %v2496_v37, %v1696_v35  ;;  %v1786_v39 = vpop.f32.mrb[17].mxu1 }
 0x902   : > { %v1787_v40 = vadd.f32 %v1786_v39, %v1691_v36 }
 0x903   : > { %v1806_v41 = vmax.f32 %v1792_v38, 0.0 }
 0x904   : > { %v1805_v43 = vmax.f32 %v1787_v40, 0.0  ;;  %v2499_v44 = vpop.f32.mrb[18].mxu1 }
 0x905   : > { %v1802_v46 = vadd.f32 %v2499_v44, %v1706_v42  ;;  %v1796_v47 = vpop.f32.mrb[19].mxu1 }
 0x906   : > { %v2597_v48 = vpack.c.bf16 %v1806_v41, %v1805_v43  ;;  %v1797_v49 = vadd.f32 %v1796_v47, %v1701_v45 }
 0x907   : > { %v1808_v50 = vmax.f32 %v1802_v46, 0.0 }
 0x908   : > { %v1807_v51 = vmax.f32 %v1797_v49, 0.0  ;;  %2598 = vmatprep.subr.bf16.mxu0 %v2597_v48 }
 0x909   : > { %2600 = vmatpush3.bf16.msra.mxu0 %v2597_v48 }
 0x90a   : > { %v2601_v52 = vpack.c.bf16 %v1808_v50, %v1807_v51 }
 0x90c   : > { %2602 = vmatprep.subr.bf16.mxu0 %v2601_v52 }
 0x90d   : > { %2604 = vmatpush3.bf16.msra.mxu0 %v2601_v52 }
 0x910   : > { %2509 = vmatmul.mubr.msk.f32.vlgmr.msra.gmra.mrb[20].mxu0 %vm629_vm2, %v2258_v53 }
 0x911   : > { %2511 = vmatprep.mubr.msk.f32.mxu0 %vm629_vm2, %v2259_v54 }
 0x914   : > { %2512 = vmatmul.mubr.msk.f32.gmra.mrb[22].mxu0 %vm629_vm2, %v2260_v55 }
 0x9e3   : > { %v2510_v59 = vpop.f32.mrb[20].mxu0 }
 0x9e4   : > { %v1912_v61 = vadd.f32 %v2510_v59, %v3207_v16  ;;  %v1892_v62 = vpop.f32.mrb[21].mxu0 }
 0x9e5   : > { %v1911_v63 = vadd.f32 %v1892_v62, %v3209_v13  ;;  %v436_v13 = vld [vmem:[%s3318_s8] sm:$0x1] }
 0x9e6   : > { %v1941_v0 = vadd.f32 %v1928_v58, %v1912_v61 }
 0x9e7   : > { %v1940_v1 = vadd.f32 %v1923_v60, %v1911_v63  ;;  %v2513_v2 = vpop.f32.mrb[22].mxu0 }
 0x9e8   : > { %v1945_v3 = vmax.f32 %v1941_v0, 0.0  ;;  %v1914_v4 = vadd.f32 %v2513_v2, %v1673_v25  ;;  %v1902_v5 = vpop.f32.mrb[23].mxu0 }
 0x9e9   : > { %v1944_v7 = vmax.f32 %v1940_v1, 0.0  ;;  %v1913_v8 = vadd.f32 %v1902_v5, %v3213_v26 }
 0x9ea   : > { %v1943_v10 = vadd.f32 %v1938_v6, %v1914_v4 }
 0x9eb   : > { %v2606_v11 = vpack.c.bf16 %v1945_v3, %v1944_v7  ;;  %v1942_v12 = vadd.f32 %v1933_v9, %v1913_v8 }
 0x9ec   : > { %v1947_v14 = vmax.f32 %v1943_v10, 0.0 }
 0x9ed   : > { %v1946_v15 = vmax.f32 %v1942_v12, 0.0  ;;  %2607 = vmatpush3.bf16.msra.mxu1 %v2606_v11 }
 0x9ee   : > { %2608 = vmatprep.subr.bf16.mxu1 %v2789_v56 }
 0x9ef   : > { %v2609_v16 = vpack.c.bf16 %v1947_v14, %v1946_v15 }
 0x9f1   : > { %2610 = vmatpush3.bf16.msra.mxu1 %v2609_v16 }
 0x9f4   : > { %2523 = vmatmul.mubr.msk.f32.vlgmr.msra.gmra.mrb[20].mxu1 %vm629_vm2, %v436_v13 }
 0xac7   : > { %v2026_v22 = vpop.f32.mrb[20].mxu1 }
 0xac8   : > { %v2027_v23 = vadd.f32 %v2026_v22, %v1956_v21  ;;  %v2524_v24 = vpop.f32.mrb[21].mxu1 }
 0xaca   : > { %v2030_v25 = vsub.f32 0.0, %v2027_v23 }
 0xacc   : > { %v2031_v26 = vmul.f32 1.442695, %v2030_v25 }
 0xace   : > { %2688 = vpow2.f32 %v2031_v26 }
 0xad8   : > { %v2689_v27 = vpop.eup %2688 }
 0xad9   : > { %v2033_v28 = vadd.f32 1.0, %v2689_v27 }
 0xadb   : > { %2690 = vrcp.f32 %v2033_v28 }
 0xae5   : > { %v2691_v29 = vpop.eup %2690 }
 0xae6   : > { %2035 = vst [vmem:[%s405_s21] sm:$0x1] %v2691_v29 }
 0xae7   : > { %2705 = shalt.err (!%p2702_p7)
}
 0xae8   : > { %s2706_s9 = scalar_lea.hbm %s3257_s28, 16  ;;  %s2710_s30 = scalar_lea.hbm %s3320_s10, 64 }
 0xae9   : > { %p2707_p9 = scmp.ne.s32.totalorder %s3257_s28, %s2706_s9  ;;  %p2711_p12 = scmp.lt.u32.totalorder %s3257_s28, %s3320_s10 }
 0xaea   : > { %p2712_p13 = scmp.lt.u32.totalorder %s2710_s30, %s2706_s9  ;;  %p2714_p1 = scmp.lt.u32.totalorder %s2706_s9, %s3257_s28 }
 0xaeb   : > { %p2708_p10 = pnand %p2707_p9, %p2902_p3 }
 0xaec   : > { %p2713_p0 = por %p2712_p13, %p2711_p12 }
 0xaed   : > { %p2709_p11 = pneg %p2708_p10 }
 0xaee   : > { %p2715_p2 = por %p2714_p1, %p2713_p0 }
 0xaf0   : > { %p2716_p4 = pnand %p2715_p2, %p2709_p11 }
 0xaf2   : > { %2719 = shalt.err (!%p2716_p4)
}
 0xaf3   : > { %2611 = dma.vmem_to_hbm [thread:$0]  (%p2902_p3), %s3259_s24, 16, %s3257_s28, %s2037_s12  }
 0xaf4 PF: > { %p2617_p5 = scmp.ge.s32.totalorder %s2786_s22, 2  ;;  %s2063_s21 = sand.u32 1, %s2758_s15  }
 0xaf5   : > { %s2064_s25 = scalar_lea.sflag [#allocation4], %s2063_s21 }
 0xaf6   : > { %p2614_p6 = pnand %p2617_p5, %p2911_p8 }
 0xaf8   : > { %2753 = dma.done.wait (!%p2614_p6), %s2064_s25, 16  }
 0xaf9   : > { %2755 = vsyncadd (!%p2614_p6), %s2064_s25, 4294967280  ;;  %s25_s22 = sadd.s32 1, %s2786_s22   ;;  %s3337_s20 = sld [smem:[#allocation6_spill]] }
 0xafa   : > { %p22_p7 = scmp.ge.s32.totalorder %s25_s22, 6   ;;  %s3338_s17 = sld [smem:[#allocation12_spill]] }
 0xafb   : > { %s3339_s18 = sld [smem:[#allocation7_spill]]  ;;  %s3340_s19 = sld [smem:[#allocation8_spill]] }
 0xafc   : > { %s3341_s27 = sld [smem:[#allocation9_spill]]  ;;  %s3342_s21 = sld [smem:[#allocation10_spill]] }
 0xafd   : > { %s3343_s15 = smov %s2762_s16  ;;  %24 = sbr.rel (!%p22_p7) target bundleno = 8 (0x8), region = 117 }
 0xaff   : > { %s3344_s16 = smov %s3337_s20 }
 0xb02   : > { %s3345_s20 = smov %s3341_s27 }
 0xb04   :  { %2068 = vsyncpa [#allocation4], 1 }
 0xb05   :  { %2070 = vsyncpa [#allocation4 + $0x1], 1 }

</bundles_post_ra>
